<compile_context>
chip_gen: v5e
topology: v5e:2x2
jax: 0.10.0
libtpu: 0.0.40
codegen_flags: <defaults>
</compile_context>

<pallas_src>
import functools

import jax
import jax.numpy as jnp
from jax.experimental import pallas as pl
from jax.experimental.pallas import tpu as pltpu


def _dws_conv_kernel(x_ref, wd_ref, bd_ref, wp_ref, scale_ref, shift_ref, o_ref,
                     *, width):
    """Fused depthwise-separable conv for one batch element.

    x_ref:     (1, H*W + 2*(W+1), Cin)  zero-padded, channels-last, spatially flat
    wd_ref:    (9, Cin)   depthwise taps, row t = ky*3 + kx
    bd_ref:    (1, Cin)   depthwise bias
    wp_ref:    (Cin, Cout) pointwise weight (pre-transposed in the wrapper)
    scale_ref: (1, Cout)  folded BN scale  = gamma / sqrt(var + eps)
    shift_ref: (1, Cout)  folded BN shift  = beta + scale * (pw_bias - mean)
    o_ref:     (1, H*W, Cout)
    """
    HW = o_ref.shape[1]
    Cin = wp_ref.shape[0]
    P = width + 1  # leading zero-pad rows in the flattened input

    # Column index (w) of every flat spatial row, for masking horizontal taps
    # that would otherwise wrap across image rows.
    rows = jax.lax.broadcasted_iota(jnp.int32, (HW, 1), 0)
    wcol = rows % width
    left_ok = wcol > 0            # valid when the tap reads column w-1 (kx == 0)
    right_ok = wcol < (width - 1)  # valid when the tap reads column w+1 (kx == 2)

    # Depthwise 3x3: 9 statically-shifted masked MACs, accumulated in f32.
    acc = jnp.zeros((HW, Cin), dtype=jnp.float32)
    for ky in range(3):
        for kx in range(3):
            start = P + (ky - 1) * width + (kx - 1)  # static offset
            tap = x_ref[0, start:start + HW, :].astype(jnp.float32)
            if kx == 0:
                tap = jnp.where(left_ok, tap, 0.0)
            elif kx == 2:
                tap = jnp.where(right_ok, tap, 0.0)
            t = ky * 3 + kx
            w_tap = wd_ref[t:t + 1, :].astype(jnp.float32)  # (1, Cin)
            acc = acc + tap * w_tap
    acc = acc + bd_ref[...].astype(jnp.float32)

    # Pointwise 1x1 conv as a single MXU matmul: (HW, Cin) @ (Cin, Cout).
    y = jnp.dot(acc, wp_ref[...].astype(jnp.float32),
                preferred_element_type=jnp.float32)

    # Folded pointwise-bias + BatchNorm, then SiLU.
    z = y * scale_ref[...].astype(jnp.float32) + shift_ref[...].astype(jnp.float32)
    o_ref[0] = (z * jax.nn.sigmoid(z)).astype(o_ref.dtype)


def depthwise_separable_conv(x, dw_w, dw_b, pw_w, pw_b, gamma, beta, mean, var,
                             eps=1e-5):
    """x: (B, Cin, H, W) f32 NCHW.  dw_w: (Cin, 3, 3), dw_b: (Cin,),
    pw_w: (Cout, Cin), pw_b: (Cout,), BN params: (Cout,)."""
    B, Cin, H, W = x.shape
    Cout = pw_w.shape[0]
    HW = H * W
    P = W + 1
    L = HW + 2 * P

    # Layout plumbing in the wrapper: NCHW -> channels-last, spatially flat,
    # zero-padded with W+1 rows front/back so every 3x3 tap is a static slice.
    x_flat = jnp.transpose(x, (0, 2, 3, 1)).reshape(B, HW, Cin)
    x_pad = jnp.pad(x_flat, ((0, 0), (P, P), (0, 0)))

    wd = jnp.transpose(dw_w.reshape(Cin, 9), (1, 0))   # (9, Cin), row = ky*3 + kx
    bd = dw_b.reshape(1, Cin)
    wp = jnp.transpose(pw_w, (1, 0))                   # (Cin, Cout), pre-transposed

    inv = gamma / jnp.sqrt(var + eps)                  # fold BN (+ pointwise bias)
    scale = inv.reshape(1, Cout)
    shift = (beta + inv * (pw_b - mean)).reshape(1, Cout)

    out_flat = pl.pallas_call(
        functools.partial(_dws_conv_kernel, width=W),
        out_shape=jax.ShapeDtypeStruct((B, HW, Cout), x.dtype),
        grid_spec=pltpu.PrefetchScalarGridSpec(
            num_scalar_prefetch=0,
            grid=(B,),
            in_specs=[
                pl.BlockSpec((1, L, Cin), lambda b: (b, 0, 0)),
                pl.BlockSpec((9, Cin), lambda b: (0, 0)),
                pl.BlockSpec((1, Cin), lambda b: (0, 0)),
                pl.BlockSpec((Cin, Cout), lambda b: (0, 0)),
                pl.BlockSpec((1, Cout), lambda b: (0, 0)),
                pl.BlockSpec((1, Cout), lambda b: (0, 0)),
            ],
            out_specs=pl.BlockSpec((1, HW, Cout), lambda b: (b, 0, 0)),
        ),
        compiler_params=pltpu.CompilerParams(
            dimension_semantics=("parallel",),
            vmem_limit_bytes=32 * 1024 * 1024,
        ),
    )(x_pad, wd, bd, wp, scale, shift)

    return jnp.transpose(out_flat.reshape(B, H, W, Cout), (0, 3, 1, 2))


def depthwise_separable_conv_ref(x, dw_w, dw_b, pw_w, pw_b, gamma, beta, mean,
                                 var, eps=1e-5):
    """Pure-JAX reference matching the PyTorch forward (BN in eval mode)."""
    B, Cin, H, W = x.shape
    Cout = pw_w.shape[0]
    y = jax.lax.conv_general_dilated(
        x, dw_w.reshape(Cin, 1, 3, 3),
        window_strides=(1, 1), padding=((1, 1), (1, 1)),
        dimension_numbers=("NCHW", "OIHW", "NCHW"),
        feature_group_count=Cin)
    y = y + dw_b[None, :, None, None]
    y = jax.lax.conv_general_dilated(
        y, pw_w.reshape(Cout, Cin, 1, 1),
        window_strides=(1, 1), padding="VALID",
        dimension_numbers=("NCHW", "OIHW", "NCHW"))
    y = y + pw_b[None, :, None, None]
    y = (y - mean[None, :, None, None]) / jnp.sqrt(var[None, :, None, None] + eps)
    y = y * gamma[None, :, None, None] + beta[None, :, None, None]
    return y * jax.nn.sigmoid(y)


if __name__ == "__main__":
    # Small shapes consistent with DepthwiseSeparableConv(in=8, out=16), 16x16 images.
    B, Cin, Cout, H, W = 2, 8, 16, 16, 16

    key = jax.random.PRNGKey(0)
    ks = jax.random.split(key, 9)
    x = jax.random.normal(ks[0], (B, Cin, H, W), dtype=jnp.float32)
    dw_w = jax.random.normal(ks[1], (Cin, 3, 3), dtype=jnp.float32) * 0.2
    dw_b = jax.random.normal(ks[2], (Cin,), dtype=jnp.float32) * 0.1
    pw_w = jax.random.normal(ks[3], (Cout, Cin), dtype=jnp.float32) * 0.2
    pw_b = jax.random.normal(ks[4], (Cout,), dtype=jnp.float32) * 0.1
    gamma = 1.0 + 0.1 * jax.random.normal(ks[5], (Cout,), dtype=jnp.float32)
    beta = 0.1 * jax.random.normal(ks[6], (Cout,), dtype=jnp.float32)
    mean = 0.1 * jax.random.normal(ks[7], (Cout,), dtype=jnp.float32)
    var = jnp.abs(jax.random.normal(ks[8], (Cout,), dtype=jnp.float32)) + 0.5

    out = depthwise_separable_conv(x, dw_w, dw_b, pw_w, pw_b, gamma, beta, mean, var)
    out = jax.block_until_ready(out)

    ref = depthwise_separable_conv_ref(x, dw_w, dw_b, pw_w, pw_b, gamma, beta,
                                       mean, var)
    assert out.shape == (B, Cout, H, W)
    assert jnp.allclose(out, ref, atol=1e-4, rtol=1e-4), \
        float(jnp.max(jnp.abs(out - ref)))

    print("KERNEL_OK")
</pallas_src>

<mosaic_0001>
module attributes {stable_mosaic.version = 11 : i64} {
  func.func @_dws_conv_kernel(%arg0: i32, %arg1: memref<1x290x8xf32, #tpu.memory_space<vmem>>, %arg2: memref<9x8xf32, #tpu.memory_space<vmem>>, %arg3: memref<1x8xf32, #tpu.memory_space<vmem>>, %arg4: memref<8x16xf32, #tpu.memory_space<vmem>>, %arg5: memref<1x16xf32, #tpu.memory_space<vmem>>, %arg6: memref<1x16xf32, #tpu.memory_space<vmem>>, %arg7: memref<1x256x16xf32, #tpu.memory_space<vmem>>) attributes {dimension_semantics = [#tpu.dimension_semantics<parallel>], iteration_bounds = array<i64: 2>, scalar_prefetch = 0 : i64, scratch_operands = 0 : i64, tpu.core_type = #tpu.core_type<tc>, window_params = [{transform_indices = @transform_0, window_bounds = array<i64: 1, 290, 8>}, {pipeline_mode = #tpu.pipeline_mode<synchronous>, transform_indices = @transform_1, window_bounds = array<i64: 9, 8>}, {pipeline_mode = #tpu.pipeline_mode<synchronous>, transform_indices = @transform_2, window_bounds = array<i64: 1, 8>}, {pipeline_mode = #tpu.pipeline_mode<synchronous>, transform_indices = @transform_3, window_bounds = array<i64: 8, 16>}, {pipeline_mode = #tpu.pipeline_mode<synchronous>, transform_indices = @transform_4, window_bounds = array<i64: 1, 16>}, {pipeline_mode = #tpu.pipeline_mode<synchronous>, transform_indices = @transform_5, window_bounds = array<i64: 1, 16>}, {transform_indices = @transform_6, window_bounds = array<i64: 1, 256, 16>}]} {
    %0 = tpu.iota {dimensions = array<i32: 0>} : vector<256x1xi32>
    %c16_i32 = arith.constant 16 : i32
    %c0_i32 = arith.constant 0 : i32
    %1 = arith.cmpi eq, %c16_i32, %c0_i32 : i32
    %c1_i32 = arith.constant 1 : i32
    %2 = arith.select %1, %c1_i32, %c16_i32 : i32
    %3 = vector.broadcast %2 : i32 to vector<256x1xi32>
    %4 = arith.remsi %0, %3 : vector<256x1xi32>
    %c0_i32_0 = arith.constant 0 : i32
    %5 = vector.broadcast %c0_i32_0 : i32 to vector<256x1xi32>
    %6 = arith.cmpi ne, %4, %5 : vector<256x1xi32>
    %c0_i32_1 = arith.constant 0 : i32
    %7 = vector.broadcast %c0_i32_1 : i32 to vector<256x1xi32>
    %8 = arith.cmpi slt, %4, %7 : vector<256x1xi32>
    %c0_i32_2 = arith.constant 0 : i32
    %9 = arith.cmpi slt, %2, %c0_i32_2 : i32
    %10 = vector.broadcast %9 : i1 to vector<256x1xi1>
    %11 = vector.broadcast %10 : vector<256x1xi1> to vector<256x1xi1>
    %12 = arith.xori %8, %11 : vector<256x1xi1>
    %13 = arith.andi %12, %6 : vector<256x1xi1>
    %14 = vector.broadcast %2 : i32 to vector<256x1xi32>
    %15 = arith.addi %4, %14 : vector<256x1xi32>
    %16 = arith.select %13, %15, %4 : vector<256x1xi1>, vector<256x1xi32>
    %c0_i32_3 = arith.constant 0 : i32
    %17 = vector.broadcast %c0_i32_3 : i32 to vector<256x1xi32>
    %18 = arith.cmpi sgt, %16, %17 : vector<256x1xi32>
    %c15_i32 = arith.constant 15 : i32
    %19 = vector.broadcast %c15_i32 : i32 to vector<256x1xi32>
    %20 = arith.cmpi slt, %16, %19 : vector<256x1xi32>
    %cst = arith.constant 0.000000e+00 : f32
    %21 = vector.broadcast %cst : f32 to vector<256x8xf32>
    %c0 = arith.constant 0 : index
    %c0_4 = arith.constant 0 : index
    %c0_5 = arith.constant 0 : index
    %22 = vector.load %arg1[%c0, %c0_4, %c0_5] : memref<1x290x8xf32, #tpu.memory_space<vmem>>, vector<1x256x8xf32>
    %23 = vector.shape_cast %22 : vector<1x256x8xf32> to vector<256x8xf32>
    %cst_6 = arith.constant 0.000000e+00 : f32
    %24 = vector.shape_cast %18 : vector<256x1xi1> to vector<256x1xi1>
    %25 = vector.broadcast %24 : vector<256x1xi1> to vector<256x8xi1>
    %26 = vector.broadcast %cst_6 : f32 to vector<256x8xf32>
    %27 = arith.select %25, %23, %26 : vector<256x8xi1>, vector<256x8xf32>
    %c0_7 = arith.constant 0 : index
    %c0_8 = arith.constant 0 : index
    %28 = vector.load %arg2[%c0_7, %c0_8] : memref<9x8xf32, #tpu.memory_space<vmem>>, vector<1x8xf32>
    %29 = vector.broadcast %28 : vector<1x8xf32> to vector<256x8xf32>
    %30 = arith.mulf %27, %29 : vector<256x8xf32>
    %31 = arith.addf %21, %30 : vector<256x8xf32>
    %c0_9 = arith.constant 0 : index
    %c1 = arith.constant 1 : index
    %c0_10 = arith.constant 0 : index
    %32 = vector.load %arg1[%c0_9, %c1, %c0_10] : memref<1x290x8xf32, #tpu.memory_space<vmem>>, vector<1x256x8xf32>
    %33 = vector.shape_cast %32 : vector<1x256x8xf32> to vector<256x8xf32>
    %c1_11 = arith.constant 1 : index
    %c0_12 = arith.constant 0 : index
    %34 = vector.load %arg2[%c1_11, %c0_12] : memref<9x8xf32, #tpu.memory_space<vmem>>, vector<1x8xf32>
    %35 = vector.broadcast %34 : vector<1x8xf32> to vector<256x8xf32>
    %36 = arith.mulf %33, %35 : vector<256x8xf32>
    %37 = arith.addf %31, %36 : vector<256x8xf32>
    %c0_13 = arith.constant 0 : index
    %c2 = arith.constant 2 : index
    %c0_14 = arith.constant 0 : index
    %38 = vector.load %arg1[%c0_13, %c2, %c0_14] : memref<1x290x8xf32, #tpu.memory_space<vmem>>, vector<1x256x8xf32>
    %39 = vector.shape_cast %38 : vector<1x256x8xf32> to vector<256x8xf32>
    %cst_15 = arith.constant 0.000000e+00 : f32
    %40 = vector.shape_cast %20 : vector<256x1xi1> to vector<256x1xi1>
    %41 = vector.broadcast %40 : vector<256x1xi1> to vector<256x8xi1>
    %42 = vector.broadcast %cst_15 : f32 to vector<256x8xf32>
    %43 = arith.select %41, %39, %42 : vector<256x8xi1>, vector<256x8xf32>
    %c2_16 = arith.constant 2 : index
    %c0_17 = arith.constant 0 : index
    %44 = vector.load %arg2[%c2_16, %c0_17] : memref<9x8xf32, #tpu.memory_space<vmem>>, vector<1x8xf32>
    %45 = vector.broadcast %44 : vector<1x8xf32> to vector<256x8xf32>
    %46 = arith.mulf %43, %45 : vector<256x8xf32>
    %47 = arith.addf %37, %46 : vector<256x8xf32>
    %c0_18 = arith.constant 0 : index
    %c16 = arith.constant 16 : index
    %c0_19 = arith.constant 0 : index
    %48 = vector.load %arg1[%c0_18, %c16, %c0_19] : memref<1x290x8xf32, #tpu.memory_space<vmem>>, vector<1x256x8xf32>
    %49 = vector.shape_cast %48 : vector<1x256x8xf32> to vector<256x8xf32>
    %cst_20 = arith.constant 0.000000e+00 : f32
    %50 = vector.shape_cast %18 : vector<256x1xi1> to vector<256x1xi1>
    %51 = vector.broadcast %50 : vector<256x1xi1> to vector<256x8xi1>
    %52 = vector.broadcast %cst_20 : f32 to vector<256x8xf32>
    %53 = arith.select %51, %49, %52 : vector<256x8xi1>, vector<256x8xf32>
    %c3 = arith.constant 3 : index
    %c0_21 = arith.constant 0 : index
    %54 = vector.load %arg2[%c3, %c0_21] : memref<9x8xf32, #tpu.memory_space<vmem>>, vector<1x8xf32>
    %55 = vector.broadcast %54 : vector<1x8xf32> to vector<256x8xf32>
    %56 = arith.mulf %53, %55 : vector<256x8xf32>
    %57 = arith.addf %47, %56 : vector<256x8xf32>
    %c0_22 = arith.constant 0 : index
    %c17 = arith.constant 17 : index
    %c0_23 = arith.constant 0 : index
    %58 = vector.load %arg1[%c0_22, %c17, %c0_23] : memref<1x290x8xf32, #tpu.memory_space<vmem>>, vector<1x256x8xf32>
    %59 = vector.shape_cast %58 : vector<1x256x8xf32> to vector<256x8xf32>
    %c4 = arith.constant 4 : index
    %c0_24 = arith.constant 0 : index
    %60 = vector.load %arg2[%c4, %c0_24] : memref<9x8xf32, #tpu.memory_space<vmem>>, vector<1x8xf32>
    %61 = vector.broadcast %60 : vector<1x8xf32> to vector<256x8xf32>
    %62 = arith.mulf %59, %61 : vector<256x8xf32>
    %63 = arith.addf %57, %62 : vector<256x8xf32>
    %c0_25 = arith.constant 0 : index
    %c18 = arith.constant 18 : index
    %c0_26 = arith.constant 0 : index
    %64 = vector.load %arg1[%c0_25, %c18, %c0_26] : memref<1x290x8xf32, #tpu.memory_space<vmem>>, vector<1x256x8xf32>
    %65 = vector.shape_cast %64 : vector<1x256x8xf32> to vector<256x8xf32>
    %cst_27 = arith.constant 0.000000e+00 : f32
    %66 = vector.shape_cast %20 : vector<256x1xi1> to vector<256x1xi1>
    %67 = vector.broadcast %66 : vector<256x1xi1> to vector<256x8xi1>
    %68 = vector.broadcast %cst_27 : f32 to vector<256x8xf32>
    %69 = arith.select %67, %65, %68 : vector<256x8xi1>, vector<256x8xf32>
    %c5 = arith.constant 5 : index
    %c0_28 = arith.constant 0 : index
    %70 = vector.load %arg2[%c5, %c0_28] : memref<9x8xf32, #tpu.memory_space<vmem>>, vector<1x8xf32>
    %71 = vector.broadcast %70 : vector<1x8xf32> to vector<256x8xf32>
    %72 = arith.mulf %69, %71 : vector<256x8xf32>
    %73 = arith.addf %63, %72 : vector<256x8xf32>
    %c0_29 = arith.constant 0 : index
    %c32 = arith.constant 32 : index
    %c0_30 = arith.constant 0 : index
    %74 = vector.load %arg1[%c0_29, %c32, %c0_30] : memref<1x290x8xf32, #tpu.memory_space<vmem>>, vector<1x256x8xf32>
    %75 = vector.shape_cast %74 : vector<1x256x8xf32> to vector<256x8xf32>
    %cst_31 = arith.constant 0.000000e+00 : f32
    %76 = vector.shape_cast %18 : vector<256x1xi1> to vector<256x1xi1>
    %77 = vector.broadcast %76 : vector<256x1xi1> to vector<256x8xi1>
    %78 = vector.broadcast %cst_31 : f32 to vector<256x8xf32>
    %79 = arith.select %77, %75, %78 : vector<256x8xi1>, vector<256x8xf32>
    %c6 = arith.constant 6 : index
    %c0_32 = arith.constant 0 : index
    %80 = vector.load %arg2[%c6, %c0_32] : memref<9x8xf32, #tpu.memory_space<vmem>>, vector<1x8xf32>
    %81 = vector.broadcast %80 : vector<1x8xf32> to vector<256x8xf32>
    %82 = arith.mulf %79, %81 : vector<256x8xf32>
    %83 = arith.addf %73, %82 : vector<256x8xf32>
    %c0_33 = arith.constant 0 : index
    %c33 = arith.constant 33 : index
    %c0_34 = arith.constant 0 : index
    %84 = vector.load %arg1[%c0_33, %c33, %c0_34] : memref<1x290x8xf32, #tpu.memory_space<vmem>>, vector<1x256x8xf32>
    %85 = vector.shape_cast %84 : vector<1x256x8xf32> to vector<256x8xf32>
    %c7 = arith.constant 7 : index
    %c0_35 = arith.constant 0 : index
    %86 = vector.load %arg2[%c7, %c0_35] : memref<9x8xf32, #tpu.memory_space<vmem>>, vector<1x8xf32>
    %87 = vector.broadcast %86 : vector<1x8xf32> to vector<256x8xf32>
    %88 = arith.mulf %85, %87 : vector<256x8xf32>
    %89 = arith.addf %83, %88 : vector<256x8xf32>
    %c0_36 = arith.constant 0 : index
    %c34 = arith.constant 34 : index
    %c0_37 = arith.constant 0 : index
    %90 = vector.load %arg1[%c0_36, %c34, %c0_37] : memref<1x290x8xf32, #tpu.memory_space<vmem>>, vector<1x256x8xf32>
    %91 = vector.shape_cast %90 : vector<1x256x8xf32> to vector<256x8xf32>
    %cst_38 = arith.constant 0.000000e+00 : f32
    %92 = vector.shape_cast %20 : vector<256x1xi1> to vector<256x1xi1>
    %93 = vector.broadcast %92 : vector<256x1xi1> to vector<256x8xi1>
    %94 = vector.broadcast %cst_38 : f32 to vector<256x8xf32>
    %95 = arith.select %93, %91, %94 : vector<256x8xi1>, vector<256x8xf32>
    %c8 = arith.constant 8 : index
    %c0_39 = arith.constant 0 : index
    %96 = vector.load %arg2[%c8, %c0_39] : memref<9x8xf32, #tpu.memory_space<vmem>>, vector<1x8xf32>
    %97 = vector.broadcast %96 : vector<1x8xf32> to vector<256x8xf32>
    %98 = arith.mulf %95, %97 : vector<256x8xf32>
    %99 = arith.addf %89, %98 : vector<256x8xf32>
    %c0_40 = arith.constant 0 : index
    %c0_41 = arith.constant 0 : index
    %100 = vector.load %arg3[%c0_40, %c0_41] : memref<1x8xf32, #tpu.memory_space<vmem>>, vector<1x8xf32>
    %101 = vector.broadcast %100 : vector<1x8xf32> to vector<256x8xf32>
    %102 = arith.addf %99, %101 : vector<256x8xf32>
    %c0_42 = arith.constant 0 : index
    %c0_43 = arith.constant 0 : index
    %103 = vector.load %arg4[%c0_42, %c0_43] : memref<8x16xf32, #tpu.memory_space<vmem>>, vector<8x16xf32>
    %cst_44 = arith.constant dense<0.000000e+00> : vector<256x16xf32>
    %104 = tpu.matmul %102, %103, %cst_44 {dimension_numbers = #tpu.dot_dimension_numbers<[1], [0], [0], [1], [0, 0, 1, 1], [], []>} : vector<256x8xf32>, vector<8x16xf32>, vector<256x16xf32> -> vector<256x16xf32>
    %c0_45 = arith.constant 0 : index
    %c0_46 = arith.constant 0 : index
    %105 = vector.load %arg5[%c0_45, %c0_46] : memref<1x16xf32, #tpu.memory_space<vmem>>, vector<1x16xf32>
    %106 = vector.broadcast %105 : vector<1x16xf32> to vector<256x16xf32>
    %107 = arith.mulf %104, %106 : vector<256x16xf32>
    %c0_47 = arith.constant 0 : index
    %c0_48 = arith.constant 0 : index
    %108 = vector.load %arg6[%c0_47, %c0_48] : memref<1x16xf32, #tpu.memory_space<vmem>>, vector<1x16xf32>
    %109 = vector.broadcast %108 : vector<1x16xf32> to vector<256x16xf32>
    %110 = arith.addf %107, %109 : vector<256x16xf32>
    %111 = arith.negf %110 : vector<256x16xf32>
    %112 = math.exp %111 : vector<256x16xf32>
    %cst_49 = arith.constant 1.000000e+00 : f32
    %113 = vector.broadcast %cst_49 : f32 to vector<256x16xf32>
    %114 = arith.addf %113, %112 : vector<256x16xf32>
    %115 = arith.divf %113, %114 : vector<256x16xf32>
    %116 = arith.mulf %110, %115 : vector<256x16xf32>
    %c0_50 = arith.constant 0 : index
    %c0_51 = arith.constant 0 : index
    %c0_52 = arith.constant 0 : index
    %117 = vector.load %arg7[%c0_50, %c0_51, %c0_52] : memref<1x256x16xf32, #tpu.memory_space<vmem>>, vector<1x256x16xf32>
    %118 = vector.shape_cast %117 : vector<1x256x16xf32> to vector<256x16xf32>
    %119 = vector.shape_cast %116 : vector<256x16xf32> to vector<1x256x16xf32>
    tpu.vector_store %arg7[%c0_50, %c0_51, %c0_52], %119 {strides = array<i32>} : memref<1x256x16xf32, #tpu.memory_space<vmem>>, vector<1x256x16xf32>,
    return
  }
  func.func @transform_0(%arg0: i32) -> (i32, i32, i32) {
    %c0_i32 = arith.constant 0 : i32
    %c0_i32_0 = arith.constant 0 : i32
    %c0_i32_1 = arith.constant 0 : i32
    return %arg0, %c0_i32, %c0_i32_0 : i32, i32, i32
  }
  func.func @transform_1(%arg0: i32) -> (i32, i32) {
    %c0_i32 = arith.constant 0 : i32
    %c0_i32_0 = arith.constant 0 : i32
    %c0_i32_1 = arith.constant 0 : i32
    return %c0_i32, %c0_i32_0 : i32, i32
  }
  func.func @transform_2(%arg0: i32) -> (i32, i32) {
    %c0_i32 = arith.constant 0 : i32
    %c0_i32_0 = arith.constant 0 : i32
    %c0_i32_1 = arith.constant 0 : i32
    return %c0_i32, %c0_i32_0 : i32, i32
  }
  func.func @transform_3(%arg0: i32) -> (i32, i32) {
    %c0_i32 = arith.constant 0 : i32
    %c0_i32_0 = arith.constant 0 : i32
    %c0_i32_1 = arith.constant 0 : i32
    return %c0_i32, %c0_i32_0 : i32, i32
  }
  func.func @transform_4(%arg0: i32) -> (i32, i32) {
    %c0_i32 = arith.constant 0 : i32
    %c0_i32_0 = arith.constant 0 : i32
    %c0_i32_1 = arith.constant 0 : i32
    return %c0_i32, %c0_i32_0 : i32, i32
  }
  func.func @transform_5(%arg0: i32) -> (i32, i32) {
    %c0_i32 = arith.constant 0 : i32
    %c0_i32_0 = arith.constant 0 : i32
    %c0_i32_1 = arith.constant 0 : i32
    return %c0_i32, %c0_i32_0 : i32, i32
  }
  func.func @transform_6(%arg0: i32) -> (i32, i32, i32) {
    %c0_i32 = arith.constant 0 : i32
    %c0_i32_0 = arith.constant 0 : i32
    %c0_i32_1 = arith.constant 0 : i32
    return %arg0, %c0_i32, %c0_i32_0 : i32, i32, i32
  }
}

</mosaic_0001>

<bundles_post_ra>
// kernel: tpu_custom_call.1
= control target key start
LH: loop header
LB: loop body
LE: loop exit
PB: predicated region body
PF: predicated region fallthrough
CT: control target
= control target key end

     0   :  { %s3120_s21 = smov 0   ;;  %s5183_s0 = inlined_call_operand.vmem [shape: f32[2,290,8], index: 0, kind: input, shape index: {}]   ;;  %s5184_s1 = inlined_call_operand.vmem [shape: f32[9,8], index: 1, kind: input, shape index: {}]   ;;  %s5185_s2 = inlined_call_operand.vmem [shape: f32[1,8], index: 2, kind: input, shape index: {}]   ;;  %s5186_s3 = inlined_call_operand.vmem [shape: f32[8,16], index: 3, kind: input, shape index: {}]   ;;  %s5187_s4 = inlined_call_operand.vmem [shape: f32[1,16], index: 4, kind: input, shape index: {}]   ;;  %s5188_s5 = inlined_call_operand.vmem [shape: f32[1,16], index: 5, kind: input, shape index: {}]   ;;  %s5189_s6 = inlined_call_operand.vmem [shape: f32[2,256,16], index: 6, kind: output, shape index: {}]  }
   0x1 LB: > { %s2802_s22 = sadd.s32 4294967295, %s3083_s21   ;;  %p2806_p0 = scmp.ge.s32.totalorder %s3083_s21, 1  ;;  %s3083_s21 = sphi %s3120_s21, %s16_s21  }
   0x2   : > { %p212_p1 = scmp.lt.s32.totalorder %s3083_s21, 3 }
   0x4   : > { %p213_p2 = pnand %p2806_p0, %p212_p1 }
   0x6   : > { %216 = sbr.rel (%p213_p2) target bundleno = 398 (0x18e), region = 44 }
   0xb   : > { %v1791_v0 = vld [vmem:[%s5186_s3] sm:$0xff]  ;;  %p242_p3 = scmp.lt.s32.totalorder %s2802_s22, 1  ;;  %v252_v1 = vlaneseq  ;;  %v3259_v61 = vld [vmem:[%s5184_s1 + $0x8] ss:$0 sm:$0xff]  ;;  %vm1792_vm4 = vcmask 64512  }
   0xc   : > { %1904 = vmatpush.msra.mxu0 %v1791_v0  ;;  %2877 = vmatpush.msra.mxu1 %v1791_v0  ;;  %v3138_v3 = vld [vmem:[%s5184_s1] ss:$0 sm:$0xff]  ;;  %v3146_v6 = vld [vmem:[%s5184_s1 + $0x1] ss:$0 sm:$0xff]  ;;  %v3151_v7 = vld [vmem:[%s5184_s1 + $0x2] ss:$0 sm:$0xff] }
   0xd   : > { %2878 = vmatpush.msra.mxu2 %v1791_v0  ;;  %2879 = vmatpush.msra.mxu3 %v1791_v0  ;;  %s5434_s22 = smov (!%p242_p3, %s2802_s22), 1  ;;  %v3133_v2 = vshrl.u32 %v252_v1, 7  ;;  %v3165_v10 = vld [vmem:[%s5184_s1 + $0x3] ss:$0 sm:$0xff]  ;;  %v3174_v13 = vld [vmem:[%s5184_s1 + $0x4] ss:$0 sm:$0xff] }
   0xe   : > { %s2880_s27 = smul.u32 296, %s5434_s22  ;;  %v3208_v34 = vld [vmem:[%s5184_s1 + $0x5] ss:$0 sm:$0xff]  ;;  %v3213_v35 = vld [vmem:[%s5184_s1 + $0x6] ss:$0 sm:$0xff] }
   0xf   : > { %v257_v4 = vadd.s32 32, %v3133_v2  ;;  %v289_v5 = vand.u32 15, %v3133_v2  ;;  %v261_v25 = vadd.s32 64, %v3133_v2  ;;  %v265_v30 = vadd.s32 96, %v3133_v2  ;;  %v3234_v52 = vld [vmem:[%s5184_s1 + $0x7] ss:$0 sm:$0xff] }
  0x10   : > { %s3156_s10 = scalar_lea.vmem %s5183_s0, %s2880_s27  ;;  %v269_v47 = vadd.s32 128, %v3133_v2 }
  0x11   : > { %v317_v8 = vand.u32 15, %v257_v4  ;;  %vm3158_vm0 = vcmp.gt.s32.totalorder %v289_v5, 0  ;;  %v733_v11 = vld [vmem:[%s3156_s10] sm:$0xff]  ;;  %v3169_v12 = vld [vmem:[%s3156_s10 + $0x10] sm:$0xff]  ;;  %v345_v43 = vand.u32 15, %v261_v25  ;;  %v373_v44 = vand.u32 15, %v265_v30 }
  0x12   : > { %v3181_v15 = vld [vmem:[%s3156_s10 + $0x20] sm:$0xff]  ;;  %v829_v16 = vsel %vm3158_vm0, %v733_v11, 0.0  ;;  %v1221_v18 = vsel %vm3158_vm0, %v3169_v12, 0.0  ;;  %v929_v21 = vld [vmem:[%s3156_s10 + $0x11] sm:$0xff] }
  0x13   : > { %vm3176_vm1 = vcmp.gt.s32.totalorder %v317_v8, 0  ;;  %v927_v17 = vld [vmem:[%s3156_s10 + $0x1] sm:$0xff]  ;;  %v863_v20 = vmul.f32 %v3138_v3, %v829_v16  ;;  %v1255_v33 = vmul.f32 %v3165_v10, %v1221_v18  ;;  %v1027_v37 = vld [vmem:[%s3156_s10 + $0x12] sm:$0xff]  ;;  %v1323_v39 = vmul.f32 %v3174_v13, %v929_v21 }
  0x14   : > { %v833_v19 = vsel %vm3176_vm1, %v3181_v15, 0.0  ;;  %v931_v22 = vld [vmem:[%s3156_s10 + $0x21] sm:$0xff]  ;;  %v961_v23 = vmul.f32 %v3146_v6, %v927_v17  ;;  %v1489_v40 = vsel %vm3158_vm0, %v3181_v15, 0.0  ;;  %v3227_v48 = vmul.f32 %v3146_v6, %v929_v21  ;;  %v3237_v53 = vld [vmem:[%s3156_s10 + $0x50] sm:$0xff] }
  0x15   : > { %v1025_v24 = vld [vmem:[%s3156_s10 + $0x2] sm:$0xff]  ;;  %v867_v26 = vmul.f32 %v3138_v3, %v833_v19  ;;  %v965_v27 = vmul.f32 %v3146_v6, %v931_v22  ;;  %v1423_v50 = vmul.f32 %v3208_v34, %v1027_v37  ;;  %v1523_v51 = vmul.f32 %v3213_v35, %v1489_v40  ;;  %v937_v8 = vld [vmem:[%s3156_s10 + $0x51] sm:$0xff]  ;;  %v3301_v40 = vld [vmem:[%s5185_s2] ss:$0 sm:$0xff] }
  0x16   : > { %v1029_v28 = vld [vmem:[%s3156_s10 + $0x22] sm:$0xff]  ;;  %v1155_v29 = vmul.f32 %v3151_v7, %v1025_v24  ;;  %v993_v31 = vadd.f32 %v961_v23, %v863_v20  ;;  %vm3242_vm2 = vcmp.gt.s32.totalorder %v345_v43, 0  ;;  %vm3246_vm3 = vcmp.gt.s32.totalorder %v373_v44, 0  ;;  %v1035_v23 = vld [vmem:[%s3156_s10 + $0x52] sm:$0xff] }
  0x17   : > { %v1159_v32 = vmul.f32 %v3151_v7, %v1029_v28  ;;  %v997_v36 = vadd.f32 %v965_v27, %v867_v26  ;;  %v935_v41 = vld [vmem:[%s3156_s10 + $0x41] sm:$0xff]  ;;  %v1229_v11 = vsel %vm3242_vm2, %v3237_v53, 0.0  ;;  %v3276_v16 = vmul.f32 %v3151_v7, %v1027_v37  ;;  %v3309_v44 = vld [vmem:[%s3156_s10 + $0x90] sm:$0xff] }
  0x18   : > { %v1187_v38 = vadd.f32 %v1155_v29, %v993_v31  ;;  %v741_v45 = vld [vmem:[%s3156_s10 + $0x40] sm:$0xff]  ;;  %v969_v58 = vmul.f32 %v3146_v6, %v935_v41  ;;  %v3279_v17 = vmul.f32 %v3174_v13, %v931_v22  ;;  %v1591_v19 = vmul.f32 %v3234_v52, %v931_v22 }
  0x19   : > { %v3221_v42 = vadd.f32 %v1159_v32, %v997_v36  ;;  %v1033_v46 = vld [vmem:[%s3156_s10 + $0x42] sm:$0xff]  ;;  %v837_v62 = vsel %vm3242_vm2, %v741_v45, 0.0  ;;  %v1263_v24 = vmul.f32 %v3165_v10, %v1229_v11  ;;  %v3288_v26 = vmul.f32 %v3208_v34, %v1029_v28 }
  0x1a   : > { %v1287_v49 = vadd.f32 %v1255_v33, %v1187_v38  ;;  %v3240_v54 = vld [vmem:[%s3156_s10 + $0x61] sm:$0xff]  ;;  %v1163_v1 = vmul.f32 %v3151_v7, %v1033_v46  ;;  %v871_v4 = vmul.f32 %v3138_v3, %v837_v62  ;;  %v1691_v29 = vmul.f32 %v3259_v61, %v1029_v28 }
  0x1b   : > { %5227 = vst [vmem:[#allocation2_spill] sm:$0xff] %v3221_v42  ;;  %v3251_v57 = vld [vmem:[%s3156_s10 + $0x60] sm:$0xff]  ;;  %v973_v59 = vmul.f32 %v3146_v6, %v3240_v54  ;;  %v1331_v30 = vmul.f32 %v3174_v13, %v937_v8  ;;  %v273_v33 = vadd.s32 160, %v3133_v2  ;;  %v401_v36 = vand.u32 15, %v269_v47  ;;  %v3480_v42 = vld [vmem:[%s3156_s10 + $0x48] sm:$0xff] }
  0x1c   : > { %v1355_v60 = vadd.f32 %v1323_v39, %v1287_v49  ;;  %v841_v63 = vsel %vm3246_vm3, %v3251_v57, 0.0  ;;  %v1037_v0 = vld [vmem:[%s3156_s10 + $0x62] sm:$0xff]  ;;  %v1001_v20 = vadd.f32 %v969_v58, %v871_v4  ;;  %v1497_v25 = vsel %vm3242_vm2, %v3251_v57, 0.0  ;;  %5254 = vst [vmem:[#allocation15_spill] sm:$0xff] %v3480_v42 }
  0x1d   : > { %v875_v5 = vmul.f32 %v3138_v3, %v841_v63  ;;  %v1167_v9 = vmul.f32 %v3151_v7, %v1037_v0  ;;  %v943_v22 = vld [vmem:[%s3156_s10 + $0x81] sm:$0xff]  ;;  %v3304_v28 = vmul.f32 %v3146_v6, %v937_v8  ;;  %v1431_v41 = vmul.f32 %v3208_v34, %v1035_v23 }
  0x1e   : > { %v1455_v18 = vadd.f32 %v1423_v50, %v1355_v60  ;;  %v1195_v31 = vadd.f32 %v1163_v1, %v1001_v20  ;;  %v749_v37 = vld [vmem:[%s3156_s10 + $0x80] sm:$0xff]  ;;  %v1531_v43 = vmul.f32 %v3213_v35, %v1497_v25  ;;  %v429_v46 = vand.u32 15, %v273_v33 }
  0x1f   : > { %v1005_v21 = vadd.f32 %v973_v59, %v875_v5  ;;  %v1041_v38 = vld [vmem:[%s3156_s10 + $0x82] sm:$0xff]  ;;  %vm3311_vm5 = vcmp.gt.s32.totalorder %v401_v36, 0  ;;  %v977_v50 = vmul.f32 %v3146_v6, %v943_v22  ;;  %v1699_v22 = vmul.f32 %v3259_v61, %v1037_v0 }
  0x20   : > { %v1555_v27 = vadd.f32 %v1523_v51, %v1455_v18  ;;  %v1295_v45 = vadd.f32 %v1263_v24, %v1195_v31  ;;  %v3316_v49 = vld [vmem:[%s3156_s10 + $0xa1] sm:$0xff]  ;;  %v845_v55 = vsel %vm3311_vm5, %v749_v37, 0.0  ;;  %v1171_v59 = vmul.f32 %v3151_v7, %v1041_v38  ;;  %v945_v18 = vld [vmem:[%s3156_s10 + $0x91] sm:$0xff] }
  0x21   : > { %v3293_v32 = vadd.f32 %v1167_v9, %v1005_v21  ;;  %v981_v58 = vmul.f32 %v3146_v6, %v3316_v49  ;;  %vm3324_vm6 = vcmp.gt.s32.totalorder %v429_v46, 0  ;;  %v3329_v63 = vld [vmem:[%s3156_s10 + $0xa0] sm:$0xff]  ;;  %v879_v1 = vmul.f32 %v3138_v3, %v845_v55  ;;  %v1043_v31 = vld [vmem:[%s3156_s10 + $0x92] sm:$0xff] }
  0x22   : > { %v1623_v39 = vadd.f32 %v1591_v19, %v1555_v27  ;;  %v1363_v60 = vadd.f32 %v1331_v30, %v1295_v45  ;;  %v1045_v4 = vld [vmem:[%s3156_s10 + $0xa2] sm:$0xff]  ;;  %v1237_v5 = vsel %vm3311_vm5, %v3309_v44, 0.0  ;;  %v1599_v9 = vmul.f32 %v3234_v52, %v3240_v54 }
  0x23   : > { %5232 = vst [vmem:[#allocation3_spill] sm:$0xff] %v3293_v32  ;;  %v849_v11 = vsel %vm3324_vm6, %v3329_v63, 0.0  ;;  %v1175_v19 = vmul.f32 %v3151_v7, %v1045_v4  ;;  %v1009_v24 = vadd.f32 %v977_v50, %v879_v1  ;;  %v1271_v25 = vmul.f32 %v3165_v10, %v1237_v5 }
  0x24   : > { %v1723_v51 = vadd.f32 %v1691_v29, %v1623_v39  ;;  %v1463_v20 = vadd.f32 %v1431_v41, %v1363_v60  ;;  %v883_v21 = vmul.f32 %v3138_v3, %v849_v11  ;;  %v3348_v27 = vmul.f32 %v3151_v7, %v1035_v23  ;;  %v3383_v60 = vld [vmem:[%s3156_s10 + $0xc0] sm:$0xff] }
  0x25   : > { %v3352_v29 = vmul.f32 %v3174_v13, %v3240_v54  ;;  %v3355_v30 = vmul.f32 %v3208_v34, %v1037_v0  ;;  %v1203_v37 = vadd.f32 %v1171_v59, %v1009_v24  ;;  %v1339_v38 = vmul.f32 %v3174_v13, %v945_v18  ;;  %v3369_v0 = vld [vmem:[%s3156_s10 + $0xc1] sm:$0xff]  ;;  %5240 = vst [vmem:[#allocation7_spill] sm:$0xff] %v3383_v60 }
  0x26   : > { %v1759_v8 = vadd.f32 %v3301_v40, %v1723_v51  ;;  %v1563_v33 = vadd.f32 %v1531_v43, %v1463_v20  ;;  %v1013_v36 = vadd.f32 %v981_v58, %v883_v21  ;;  %v3361_v23 = vmul.f32 %v3146_v6, %v945_v18  ;;  %5237 = vst [vmem:[#allocation4_spill] sm:$0xff] %v3369_v0  ;;  %v3375_v51 = vld [vmem:[%s3156_s10 + $0xc2] sm:$0xff] }
  0x27   : > { %v1505_v54 = vsel %vm3311_vm5, %v3329_v63, 0.0  ;;  %v277_v39 = vadd.s32 192, %v3133_v2  ;;  %v281_v41 = vadd.s32 224, %v3133_v2  ;;  %v1303_v46 = vadd.f32 %v1271_v25, %v1203_v37  ;;  %5239 = vst [vmem:[#allocation6_spill] sm:$0xff] %v3375_v51  ;;  %v955_v11 = vld [vmem:[%s3156_s10 + $0xe1] sm:$0xff] }
  0x28   : > { %2810 = vmatmul.msk.f32.vlgmr.msra.gmra.mxu0 %vm1792_vm4, %v1759_v8  ;;  %v1631_v43 = vadd.f32 %v1599_v9, %v1563_v33  ;;  %v3371_v45 = vadd.f32 %v1175_v19, %v1013_v36  ;;  %v1439_v50 = vmul.f32 %v3208_v34, %v1043_v31  ;;  %v3378_v47 = vmul.f32 %v3151_v7, %v1043_v31  ;;  %v3387_v9 = vld [vmem:[%s3156_s10 + $0xd0] sm:$0xff]  ;;  %v3401_v21 = vld [vmem:[%s3156_s10 + $0xe0] sm:$0xff] }
  0x29   : > { %v1607_v55 = vmul.f32 %v3234_v52, %v3316_v49  ;;  %v457_v58 = vand.u32 15, %v277_v39  ;;  %v485_v59 = vand.u32 15, %v281_v41  ;;  %v1371_v5 = vadd.f32 %v1339_v38, %v1303_v46  ;;  %v1053_v37 = vld [vmem:[%s3156_s10 + $0xe2] sm:$0xff] }
  0x2a   : > { %5238 = vst [vmem:[#allocation5_spill] sm:$0xff] %v3371_v45  ;;  %v1731_v1 = vadd.f32 %v1699_v22, %v1631_v43  ;;  %v1539_v8 = vmul.f32 %v3213_v35, %v1505_v54  ;;  %v985_v18 = vmul.f32 %v3146_v6, %v3369_v0  ;;  %v5243_v20 = vmov 0  ;;  %v734_v43 = vld [vmem:[%s3156_s10 + $0x8] sm:$0xff] }
  0x2b   : > { %vm3392_vm7 = vcmp.gt.s32.totalorder %v457_v58, 0  ;;  %vm3396_vm8 = vcmp.gt.s32.totalorder %v485_v59, 0  ;;  %v989_v24 = vmul.f32 %v3146_v6, %v955_v11  ;;  %v1179_v25 = vmul.f32 %v3151_v7, %v3375_v51  ;;  %v1051_v51 = vld [vmem:[%s3156_s10 + $0xd2] sm:$0xff]  ;;  %v928_v0 = vld [vmem:[%s3156_s10 + $0x9] sm:$0xff] }
  0x2c   : > { %v5244_v20 = vsel %vm3396_vm8, 4294967295, %v5243_v20  ;;  %v1767_v22 = vadd.f32 %v3301_v40, %v1731_v1  ;;  %v1471_v31 = vadd.f32 %v1439_v50, %v1371_v5  ;;  %v853_v33 = vsel %vm3392_vm7, %v3383_v60, 0.0  ;;  %v953_v1 = vld [vmem:[%s3156_s10 + $0xd1] sm:$0xff] }
  0x2d   : > { %5245 = vst [vmem:[#allocation8_spill] sm:$0xff] %v5244_v20  ;;  %v857_v36 = vsel %vm3396_vm8, %v3401_v21, 0.0  ;;  %v887_v38 = vmul.f32 %v3138_v3, %v853_v33  ;;  %v1183_v39 = vmul.f32 %v3151_v7, %v1053_v37  ;;  %v1245_v41 = vsel %vm3392_vm7, %v3387_v9, 0.0 }
  0x2e   : > { %v891_v54 = vmul.f32 %v3138_v3, %v857_v36  ;;  %2818 = vmatmul.msk.f32.vlgmr.msra.gmra.mxu1 %vm1792_vm4, %v1767_v22  ;;  %v3424_v46 = vmul.f32 %v3174_v13, %v3316_v49  ;;  %v3427_v50 = vmul.f32 %v3208_v34, %v1045_v4  ;;  %v1571_v58 = vadd.f32 %v1539_v8, %v1471_v31 }
  0x2f   : > { %v1707_v59 = vmul.f32 %v3259_v61, %v1045_v4  ;;  %v3432_v5 = vmul.f32 %v3146_v6, %v953_v1  ;;  %v1017_v33 = vadd.f32 %v985_v18, %v887_v38  ;;  %v1279_v22 = vmul.f32 %v3165_v10, %v1245_v41  ;;  %v738_v4 = vld [vmem:[%s3156_s10 + $0x28] sm:$0xff] }
  0x30   : > { %v1021_v36 = vadd.f32 %v989_v24, %v891_v54  ;;  %v1639_v49 = vadd.f32 %v1607_v55, %v1571_v58  ;;  %v3438_v45 = vmul.f32 %v3151_v7, %v1051_v51  ;;  %v254_v8 = vadd.s32 8, %v3133_v2  ;;  %v3451_v41 = vld [vmem:[%s3156_s10 + $0x29] sm:$0xff] }
  0x31   : > { %v864_v31 = vmul.f32 %v3138_v3, %v734_v43  ;;  %v1211_v60 = vadd.f32 %v1179_v25, %v1017_v33  ;;  %v1347_v18 = vmul.f32 %v3174_v13, %v953_v1  ;;  %v868_v24 = vmul.f32 %v3138_v3, %v738_v4  ;;  %v1026_v43 = vld [vmem:[%s3156_s10 + $0xa] sm:$0xff]  ;;  %v736_v33 = vld [vmem:[%s3156_s10 + $0x18] sm:$0xff] }
  0x32   : > { %5246 = vst [vmem:[#allocation9_spill] sm:$0xff] %v3438_v45  ;;  %v3443_v32 = vadd.f32 %v1183_v39, %v1021_v36  ;;  %v1739_v38 = vadd.f32 %v1707_v59, %v1639_v49  ;;  %v1513_v55 = vsel %vm3392_vm7, %v3401_v21, 0.0  ;;  %v296_v54 = vand.u32 15, %v254_v8  ;;  %v930_v8 = vld [vmem:[%s3156_s10 + $0x19] sm:$0xff] }
  0x33   : > { %v962_v58 = vmul.f32 %v3146_v6, %v928_v0  ;;  %v1311_v25 = vadd.f32 %v1279_v22, %v1211_v60  ;;  %v3456_v39 = vmul.f32 %v3174_v13, %v955_v11  ;;  %v1447_v1 = vmul.f32 %v3208_v34, %v1051_v51  ;;  %v3471_v22 = vld [vmem:[%s3156_s10 + $0x1a] sm:$0xff] }
  0x34   : > { %5247 = vst [vmem:[#allocation10_spill] sm:$0xff] %v3443_v32  ;;  %v966_v59 = vmul.f32 %v3146_v6, %v3451_v41  ;;  %v1775_v19 = vadd.f32 %v3301_v40, %v1739_v38  ;;  %v3464_v36 = vmul.f32 %v3208_v34, %v1053_v37  ;;  %vm3466_vm9 = vcmp.lt.s32.totalorder %v296_v54, 15 }
  0x35   : > { %5248 = vst [vmem:[#allocation11_spill] sm:$0xff] %v3456_v39  ;;  %v994_v60 = vadd.f32 %v962_v58, %v864_v31  ;;  %v1379_v49 = vadd.f32 %v1347_v18, %v1311_v25  ;;  %v1547_v51 = vmul.f32 %v3213_v35, %v1513_v55  ;;  %v1122_v38 = vsel %vm3466_vm9, %v1026_v43, 0.0  ;;  %v3488_v58 = vld [vmem:[%s3156_s10 + $0x49] sm:$0xff] }
  0x36   : > { %5249 = vst [vmem:[#allocation12_spill] sm:$0xff] %v3464_v36  ;;  %v3475_v32 = vadd.f32 %v966_v59, %v868_v24  ;;  %2826 = vmatmul.msk.f32.vlgmr.msra.gmra.mxu2 %vm1792_vm4, %v1775_v19  ;;  %v1615_v31 = vmul.f32 %v3234_v52, %v955_v11  ;;  %v1715_v54 = vmul.f32 %v3259_v61, %v1053_v37  ;;  %v3494_v43 = vld [vmem:[%s3156_s10 + $0x2a] sm:$0xff]  ;;  %v1390_v59 = vsel %vm3466_vm9, %v3471_v22, 0.0 }
  0x37   : > { %5252 = vst [vmem:[#allocation13_spill] sm:$0xff] %v3471_v22  ;;  %v1156_v18 = vmul.f32 %v3151_v7, %v1122_v38  ;;  %v1256_v55 = vmul.f32 %v3165_v10, %v736_v33  ;;  %v1479_v24 = vadd.f32 %v1447_v1, %v1379_v49  ;;  %v3491_v25 = vmul.f32 %v3138_v3, %v736_v33  ;;  %v3501_v37 = vld [vmem:[%s3156_s10 + $0x68] sm:$0xff] }
  0x38   : > { %5253 = vst [vmem:[#allocation14_spill] sm:$0xff] %v3475_v32  ;;  %v262_v11 = vadd.s32 72, %v3133_v2  ;;  %v1324_v38 = vmul.f32 %v3174_v13, %v930_v8  ;;  %v872_v1 = vmul.f32 %v3138_v3, %v3480_v42  ;;  %v876_v33 = vmul.f32 %v3138_v3, %v3501_v37  ;;  %v3509_v49 = vld [vmem:[%s3156_s10 + $0x69] sm:$0xff] }
  0x39   : > { %5255 = vst [vmem:[#allocation16_spill] sm:$0xff] %v3488_v58  ;;  %v1188_v19 = vadd.f32 %v1156_v18, %v994_v60  ;;  %v1579_v32 = vadd.f32 %v1547_v51, %v1479_v24  ;;  %v970_v39 = vmul.f32 %v3146_v6, %v3488_v58  ;;  %v974_v60 = vmul.f32 %v3146_v6, %v3509_v49  ;;  %v3516_v18 = vld [vmem:[%s3156_s10 + $0x4a] sm:$0xff]  ;;  %v3526_v24 = vld [vmem:[%s3156_s10 + $0x58] sm:$0xff] }
  0x3a   : > { %5256 = vst [vmem:[#allocation17_spill] sm:$0xff] %v3491_v25  ;;  %v352_v36 = vand.u32 15, %v262_v11  ;;  %v3519_v42 = vmul.f32 %v3146_v6, %v930_v8  ;;  %v1424_v25 = vmul.f32 %v3208_v34, %v1390_v59  ;;  %v1658_v51 = vsel %vm3466_vm9, %v3494_v43, 0.0  ;;  %v3535_v8 = vld [vmem:[%s3156_s10 + $0x5a] sm:$0xff] }
  0x3b   : > { %5257 = vst [vmem:[#allocation18_spill] sm:$0xff] %v3494_v43  ;;  %v1288_v22 = vadd.f32 %v1256_v55, %v1188_v19  ;;  %v1647_v11 = vadd.f32 %v1615_v31, %v1579_v32  ;;  %v1002_v45 = vadd.f32 %v970_v39, %v872_v1  ;;  %v3532_v20 = vadd.f32 %v974_v60, %v876_v33  ;;  %v3542_v19 = vld [vmem:[%s3156_s10 + $0x59] sm:$0xff]  ;;  %v3577_v43 = vld [vmem:[%s3156_s10 + $0x8a] sm:$0xff] }
  0x3c   : > { %5258 = vst [vmem:[#allocation19_spill] sm:$0xff] %v3516_v18  ;;  %vm3528_vm10 = vcmp.lt.s32.totalorder %v352_v36, 15  ;;  %v3538_v55 = vmul.f32 %v3165_v10, %v738_v4  ;;  %v1524_v0 = vmul.f32 %v3213_v35, %v738_v4  ;;  %v3548_v36 = vld [vmem:[%s3156_s10 + $0x88] sm:$0xff]  ;;  %v1592_v31 = vmul.f32 %v3234_v52, %v3451_v41 }
  0x3d   : > { %5259 = vst [vmem:[#allocation20_spill] sm:$0xff] %v3519_v42  ;;  %v1356_v59 = vadd.f32 %v1324_v38, %v1288_v22  ;;  %v1130_v32 = vsel %vm3528_vm10, %v3516_v18, 0.0  ;;  %v1747_v39 = vadd.f32 %v1715_v54, %v1647_v11  ;;  %v1264_v22 = vmul.f32 %v3165_v10, %v3526_v24  ;;  %v3556_v4 = vld [vmem:[%s3156_s10 + $0x89] sm:$0xff]  ;;  %v3669_v42 = vld [vmem:[%s3156_s10 + $0xda] sm:$0xff] }
  0x3e   : > { %5260 = vst [vmem:[#allocation21_spill] sm:$0xff] %v3526_v24  ;;  %v1164_v1 = vmul.f32 %v3151_v7, %v1130_v32  ;;  %v1692_v33 = vmul.f32 %v3259_v61, %v1658_v51  ;;  %v1398_v60 = vsel %vm3528_vm10, %v3535_v8, 0.0  ;;  %v270_v54 = vadd.s32 136, %v3133_v2  ;;  %v3565_v32 = vld [vmem:[%s3156_s10 + $0x6a] sm:$0xff] }
  0x3f   : > { %5263 = vst [vmem:[#allocation22_spill] sm:$0xff] %v3532_v20  ;;  %v1456_v38 = vadd.f32 %v1424_v25, %v1356_v59  ;;  %v1783_v11 = vadd.f32 %v3301_v40, %v1747_v39  ;;  %v1332_v18 = vmul.f32 %v3174_v13, %v3542_v19  ;;  %v880_v25 = vmul.f32 %v3138_v3, %v3548_v36  ;;  %v948_v24 = vld [vmem:[%s3156_s10 + $0xa9] sm:$0xff] }
  0x40   : > { %5264 = vst [vmem:[#allocation23_spill] sm:$0xff] %v3535_v8  ;;  %v1196_v20 = vadd.f32 %v1164_v1, %v1002_v45  ;;  %v408_v59 = vand.u32 15, %v270_v54  ;;  %v978_v39 = vmul.f32 %v3146_v6, %v3556_v4  ;;  %v3582_v45 = vmul.f32 %v3174_v13, %v3451_v41 }
  0x41   : > { %5265 = vst [vmem:[#allocation24_spill] sm:$0xff] %v3538_v55  ;;  %v754_v55 = vld [vmem:[%s3156_s10 + $0xa8] sm:$0xff]  ;;  %v1556_v51 = vadd.f32 %v1524_v0, %v1456_v38  ;;  %2834 = vmatmul.msk.f32.vlgmr.msra.gmra.mxu3 %vm1792_vm4, %v1783_v11  ;;  %v1432_v0 = vmul.f32 %v3208_v34, %v1398_v60  ;;  %v3586_v38 = vld [vmem:[%s3156_s10 + $0x98] sm:$0xff]  ;;  %v982_v54 = vmul.f32 %v3146_v6, %v948_v24 }
  0x42   : > { %5266 = vst [vmem:[#allocation25_spill] sm:$0xff] %v3542_v19  ;;  %v884_v8 = vmul.f32 %v3138_v3, %v754_v55  ;;  %v1296_v1 = vadd.f32 %v1264_v22, %v1196_v20  ;;  %vm3592_vm11 = vcmp.lt.s32.totalorder %v408_v59, 15  ;;  %v1010_v41 = vadd.f32 %v978_v39, %v880_v25  ;;  %v3602_v60 = vld [vmem:[%s3156_s10 + $0x99] sm:$0xff]  ;;  %v3617_v59 = vld [vmem:[%s3156_s10 + $0xc8] sm:$0xff] }
  0x43   : > { %5267 = vst [vmem:[#allocation26_spill] sm:$0xff] %v3548_v36  ;;  %v1624_v36 = vadd.f32 %v1592_v31, %v1556_v51  ;;  %v1532_v22 = vmul.f32 %v3213_v35, %v3501_v37  ;;  %v1138_v58 = vsel %vm3592_vm11, %v3577_v43, 0.0  ;;  %v3611_v51 = vmul.f32 %v3165_v10, %v3501_v37 }
  0x44   : > { %5268 = vst [vmem:[#allocation27_spill] sm:$0xff] %v3556_v4  ;;  %v1666_v4 = vsel %vm3528_vm10, %v3565_v32, 0.0  ;;  %v1364_v20 = vadd.f32 %v1332_v18, %v1296_v1  ;;  %v3604_v19 = vadd.f32 %v982_v54, %v884_v8  ;;  %v1172_v25 = vmul.f32 %v3151_v7, %v1138_v58  ;;  %v3620_v8 = vld [vmem:[%s3156_s10 + $0xc9] sm:$0xff] }
  0x45   : > { %5269 = vst [vmem:[#allocation28_spill] sm:$0xff] %v3565_v32  ;;  %v1724_v31 = vadd.f32 %v1692_v33, %v1624_v36  ;;  %v1272_v18 = vmul.f32 %v3165_v10, %v3586_v38  ;;  %v1600_v1 = vmul.f32 %v3234_v52, %v3509_v49  ;;  %v1700_v36 = vmul.f32 %v3259_v61, %v1666_v4 }
  0x46   : > { %5270 = vst [vmem:[#allocation29_spill] sm:$0xff] %v3577_v43  ;;  %v1464_v39 = vadd.f32 %v1432_v0, %v1364_v20  ;;  %v1204_v54 = vadd.f32 %v1172_v25, %v1010_v41  ;;  %v1340_v58 = vmul.f32 %v3174_v13, %v3602_v60  ;;  %v762_v43 = vld [vmem:[%s3156_s10 + $0xe8] sm:$0xff]  ;;  %v888_v20 = vmul.f32 %v3138_v3, %v3617_v59 }
  0x47   : > { %5271 = vst [vmem:[#allocation30_spill] sm:$0xff] %v3582_v45  ;;  %v3597_v45 = vld [vmem:[%s3156_s10 + $0x9a] sm:$0xff]  ;;  %v1760_v33 = vadd.f32 %v3301_v40, %v1724_v31  ;;  %v892_v4 = vmul.f32 %v3138_v3, %v762_v43  ;;  %v986_v31 = vmul.f32 %v3146_v6, %v3620_v8  ;;  %v3643_v41 = vld [vmem:[%s3156_s10 + $0xaa] sm:$0xff] }
  0x48   : > { %5272 = vst [vmem:[#allocation31_spill] sm:$0xff] %v3586_v38  ;;  %v1406_v37 = vsel %vm3592_vm11, %v3597_v45, 0.0  ;;  %v1564_v0 = vadd.f32 %v1532_v22, %v1464_v39  ;;  %v1304_v25 = vadd.f32 %v1272_v18, %v1204_v54  ;;  %v1540_v38 = vmul.f32 %v3213_v35, %v754_v55  ;;  %v3660_v18 = vld [vmem:[%s3156_s10 + $0xd8] sm:$0xff] }
  0x49   : > { %5275 = vst [vmem:[#allocation32_spill] sm:$0xff] %v3597_v45  ;;  %2811 = vmatmul.msk.f32.gmra.mxu0 %vm1792_vm4, %v1760_v33  ;;  %v1440_v45 = vmul.f32 %v3208_v34, %v1406_v37  ;;  %v3656_v33 = vmul.f32 %v3165_v10, %v754_v55  ;;  %v1018_v54 = vadd.f32 %v986_v31, %v888_v20  ;;  %v1674_v55 = vsel %vm3592_vm11, %v3643_v41, 0.0 }
  0x4a   : > { %5276 = vst [vmem:[#allocation33_spill] sm:$0xff] %v3602_v60  ;;  %v3653_v60 = vmul.f32 %v3174_v13, %v3509_v49  ;;  %v1372_v37 = vadd.f32 %v1340_v58, %v1304_v25  ;;  %v255_v25 = vadd.s32 16, %v3133_v2 }
  0x4b   : > { %5277 = vst [vmem:[#allocation34_spill] sm:$0xff] %v3604_v19  ;;  %v278_v19 = vadd.s32 200, %v3133_v2 }
  0x4c   : > { %5278 = vst [vmem:[#allocation35_spill] sm:$0xff] %v3611_v51  ;;  %v3637_v51 = vld [vmem:[%s3156_s10 + $0xe9] sm:$0xff]  ;;  %v1472_v20 = vadd.f32 %v1440_v45, %v1372_v37  ;;  %v1708_v45 = vmul.f32 %v3259_v61, %v1674_v55 }
  0x4d   : > { %5279 = vst [vmem:[#allocation36_spill] sm:$0xff] %v3617_v59  ;;  %v464_v22 = vand.u32 15, %v278_v19  ;;  %v990_v39 = vmul.f32 %v3146_v6, %v3637_v51  ;;  %v3649_v59 = vld [vmem:[%s3156_s10 + $0xca] sm:$0xff]  ;;  %v1031_v19 = vld [vmem:[%s3156_s10 + $0x32] sm:$0xff] }
  0x4e   : > { %5280 = vst [vmem:[#allocation37_spill] sm:$0xff] %v3620_v8  ;;  %v1632_v8 = vadd.f32 %v1600_v1, %v1564_v0  ;;  %v3672_v1 = vmul.f32 %v3174_v13, %v948_v24  ;;  %v3678_v0 = vld [vmem:[%s3156_s10 + $0xd9] sm:$0xff] }
  0x4f   : > { %5281 = vst [vmem:[#allocation38_spill] sm:$0xff] %v3649_v59  ;;  %vm3662_vm12 = vcmp.lt.s32.totalorder %v464_v22, 15  ;;  %v3666_v32 = vadd.f32 %v990_v39, %v892_v4  ;;  %v1608_v4 = vmul.f32 %v3234_v52, %v948_v24  ;;  %v259_v22 = vadd.s32 48, %v3133_v2  ;;  %v3695_v24 = vld [vmem:[%s3156_s10 + $0xea] sm:$0xff] }
  0x50   : > { %5285 = vst [vmem:[#allocation40_spill] sm:$0xff] %v3669_v42  ;;  %v1732_v49 = vadd.f32 %v1700_v36, %v1632_v8  ;;  %v1146_v58 = vsel %vm3662_vm12, %v3649_v59, 0.0  ;;  %v1280_v8 = vmul.f32 %v3165_v10, %v3660_v18  ;;  %v1414_v11 = vsel %vm3662_vm12, %v3669_v42, 0.0 }
  0x51   : > { %5284 = vst [vmem:[#allocation39_spill] sm:$0xff] %v3666_v32  ;;  %v1180_v31 = vmul.f32 %v3151_v7, %v1146_v58  ;;  %v1572_v39 = vadd.f32 %v1540_v38, %v1472_v20  ;;  %v1348_v58 = vmul.f32 %v3174_v13, %v3678_v0  ;;  %v1548_v32 = vmul.f32 %v3213_v35, %v762_v43 }
  0x52   : > { %5286 = vst [vmem:[#allocation41_spill] sm:$0xff] %v3672_v1  ;;  %v1768_v36 = vadd.f32 %v3301_v40, %v1732_v49  ;;  %v3701_v49 = vmul.f32 %v3165_v10, %v762_v43  ;;  %v303_v59 = vand.u32 15, %v255_v25  ;;  %v331_v42 = vand.u32 15, %v259_v22 }
  0x53   : > { %v1212_v37 = vadd.f32 %v1180_v31, %v1018_v54  ;;  %v1640_v38 = vadd.f32 %v1608_v4, %v1572_v39  ;;  %v1448_v55 = vmul.f32 %v3208_v34, %v1414_v11  ;;  %v1616_v54 = vmul.f32 %v3234_v52, %v3637_v51  ;;  %v933_v31 = vld [vmem:[%s3156_s10 + $0x31] sm:$0xff] }
  0x54   : > { %2819 = vmatmul.msk.f32.gmra.mxu1 %vm1792_vm4, %v1768_v36  ;;  %5287 = vst [vmem:[#allocation42_spill] sm:$0xff] %v3701_v49  ;;  %v1682_v36 = vsel %vm3662_vm12, %v3695_v24, 0.0  ;;  %vm3711_vm13 = vcmp.gt.s32.totalorder %v303_v59, 0  ;;  %vm3715_vm14 = vcmp.gt.s32.totalorder %v331_v42, 0  ;;  %v5290_v43 = vmov 0  ;;  %v3720_v4 = vld [vmem:[%s3156_s10 + $0x30] sm:$0xff] }
  0x55   : > { %v1312_v20 = vadd.f32 %v1280_v8, %v1212_v37  ;;  %v5291_v43 = vsel %vm3715_vm14, 4294967295, %v5290_v43  ;;  %v967_v8 = vmul.f32 %v3146_v6, %v933_v31  ;;  %v1740_v11 = vadd.f32 %v1708_v45, %v1640_v38 }
  0x56   : > { %5292 = vst [vmem:[#allocation43_spill] sm:$0xff] %v5291_v43  ;;  %v831_v22 = vsel %vm3711_vm13, %v3169_v12, 0.0  ;;  %v835_v59 = vsel %vm3715_vm14, %v3720_v4, 0.0  ;;  %v1161_v37 = vmul.f32 %v3151_v7, %v1031_v19  ;;  %v1223_v45 = vsel %vm3711_vm13, %v3181_v15, 0.0 }
  0x57   : > { %v1380_v25 = vadd.f32 %v1348_v58, %v1312_v20  ;;  %v865_v42 = vmul.f32 %v3138_v3, %v831_v22  ;;  %v869_v39 = vmul.f32 %v3138_v3, %v835_v59  ;;  %v1776_v58 = vadd.f32 %v3301_v40, %v1740_v11 }
  0x58   : > { %v1257_v12 = vmul.f32 %v3165_v10, %v1223_v45  ;;  %v1491_v20 = vsel %vm3711_vm13, %v3720_v4, 0.0  ;;  %v263_v59 = vadd.s32 80, %v3133_v2  ;;  %v267_v49 = vadd.s32 112, %v3133_v2 }
  0x59   : > { %v1480_v38 = vadd.f32 %v1448_v55, %v1380_v25  ;;  %v995_v43 = vadd.f32 %v3227_v48, %v865_v42  ;;  %v999_v22 = vadd.f32 %v967_v8, %v869_v39  ;;  %2827 = vmatmul.msk.f32.gmra.mxu2 %vm1792_vm4, %v1776_v58  ;;  %v3747_v15 = vmul.f32 %v3174_v13, %v3637_v51 }
  0x5a   : > { %v1716_v11 = vmul.f32 %v3259_v61, %v1682_v36  ;;  %v359_v25 = vand.u32 15, %v263_v59  ;;  %v387_v42 = vand.u32 15, %v267_v49  ;;  %v3757_v45 = vmul.f32 %v3174_v13, %v933_v31  ;;  %v941_v36 = vld [vmem:[%s3156_s10 + $0x71] sm:$0xff] }
  0x5b   : > { %v1580_v55 = vadd.f32 %v1548_v32, %v1480_v38  ;;  %v1189_v1 = vadd.f32 %v3276_v16, %v995_v43  ;;  %v3754_v8 = vadd.f32 %v1161_v37, %v999_v22  ;;  %v3760_v51 = vmul.f32 %v3208_v34, %v1031_v19  ;;  %v3773_v49 = vld [vmem:[%s3156_s10 + $0x70] sm:$0xff] }
  0x5c   : > { %v1525_v32 = vmul.f32 %v3213_v35, %v1491_v20  ;;  %vm3764_vm15 = vcmp.gt.s32.totalorder %v359_v25, 0  ;;  %vm3768_vm0 = vcmp.gt.s32.totalorder %v387_v42, 0  ;;  %v5296_v16 = vmov 0  ;;  %v1039_v20 = vld [vmem:[%s3156_s10 + $0x72] sm:$0xff] }
  0x5d   : > { %5293 = vst [vmem:[#allocation44_spill] sm:$0xff] %v3754_v8  ;;  %v1648_v39 = vadd.f32 %v1616_v54, %v1580_v55  ;;  %v1289_v58 = vadd.f32 %v1257_v12, %v1189_v1  ;;  %v5297_v16 = vsel %vm3768_vm0, 4294967295, %v5296_v16  ;;  %v975_v54 = vmul.f32 %v3146_v6, %v941_v36 }
  0x5e   : > { %5298 = vst [vmem:[#allocation45_spill] sm:$0xff] %v5297_v16  ;;  %v839_v37 = vsel %vm3764_vm15, %v3237_v53, 0.0  ;;  %v843_v12 = vsel %vm3768_vm0, %v3773_v49, 0.0  ;;  %v1231_v22 = vsel %vm3764_vm15, %v3251_v57, 0.0  ;;  %v1593_v53 = vmul.f32 %v3234_v52, %v933_v31 }
  0x5f   : > { %v1748_v43 = vadd.f32 %v1716_v11, %v1648_v39  ;;  %v1357_v59 = vadd.f32 %v3279_v17, %v1289_v58  ;;  %v873_v55 = vmul.f32 %v3138_v3, %v839_v37  ;;  %v877_v1 = vmul.f32 %v3138_v3, %v843_v12 }
  0x60   : > { %v1169_v11 = vmul.f32 %v3151_v7, %v1039_v20  ;;  %v271_v42 = vadd.s32 144, %v3133_v2  ;;  %v275_v39 = vadd.s32 176, %v3133_v2  ;;  %v1265_v58 = vmul.f32 %v3165_v10, %v1231_v22 }
  0x61   : > { %v1784_v25 = vadd.f32 %v3301_v40, %v1748_v43  ;;  %v1457_v48 = vadd.f32 %v3288_v26, %v1357_v59  ;;  %v1003_v57 = vadd.f32 %v3304_v28, %v873_v55  ;;  %v1007_v17 = vadd.f32 %v975_v54, %v877_v1  ;;  %v949_v54 = vld [vmem:[%s3156_s10 + $0xb1] sm:$0xff] }
  0x62   : > { %v1693_v37 = vmul.f32 %v3259_v61, %v1031_v19  ;;  %v415_v43 = vand.u32 15, %v271_v42  ;;  %v443_v12 = vand.u32 15, %v275_v39  ;;  %v3806_v28 = vmul.f32 %v3174_v13, %v941_v36 }
  0x63   : > { %2835 = vmatmul.msk.f32.gmra.mxu3 %vm1792_vm4, %v1784_v25  ;;  %v1557_v16 = vadd.f32 %v1525_v32, %v1457_v48  ;;  %v1197_v26 = vadd.f32 %v3348_v27, %v1003_v57  ;;  %v3803_v59 = vadd.f32 %v1169_v11, %v1007_v17  ;;  %v1499_v19 = vsel %vm3764_vm15, %v3773_v49, 0.0  ;;  %v3821_v48 = vld [vmem:[%s3156_s10 + $0xb0] sm:$0xff] }
  0x64   : > { %vm3812_vm2 = vcmp.gt.s32.totalorder %v415_v43, 0  ;;  %vm3816_vm5 = vcmp.gt.s32.totalorder %v443_v12, 0  ;;  %v5302_v55 = vmov 0  ;;  %v983_v27 = vmul.f32 %v3146_v6, %v949_v54  ;;  %v1047_v25 = vld [vmem:[%s3156_s10 + $0xb2] sm:$0xff] }
  0x65   : > { %5299 = vst [vmem:[#allocation46_spill] sm:$0xff] %v3803_v59  ;;  %v5303_v55 = vsel %vm3816_vm5, 4294967295, %v5302_v55  ;;  %v1625_v32 = vadd.f32 %v1593_v53, %v1557_v16  ;;  %v1297_v1 = vadd.f32 %v1265_v58, %v1197_v26  ;;  %v847_v11 = vsel %vm3812_vm2, %v3309_v44, 0.0 }
  0x66   : > { %5304 = vst [vmem:[#allocation47_spill] sm:$0xff] %v5303_v55  ;;  %v851_v38 = vsel %vm3816_vm5, %v3821_v48, 0.0  ;;  %v881_v42 = vmul.f32 %v3138_v3, %v847_v11  ;;  %v1177_v57 = vmul.f32 %v3151_v7, %v1047_v25  ;;  %v1239_v16 = vsel %vm3812_vm2, %v3329_v63, 0.0 }
  0x67   : > { %v885_v39 = vmul.f32 %v3138_v3, %v851_v38  ;;  %v1725_v53 = vadd.f32 %v1693_v37, %v1625_v32  ;;  %v1365_v17 = vadd.f32 %v3352_v29, %v1297_v1  ;;  %v1533_v44 = vmul.f32 %v3213_v35, %v1499_v19 }
  0x68   : > { %v1601_v58 = vmul.f32 %v3234_v52, %v941_v36  ;;  %v1011_v43 = vadd.f32 %v3361_v23, %v881_v42  ;;  %v1273_v26 = vmul.f32 %v3165_v10, %v1239_v16  ;;  %v1507_v11 = vsel %vm3812_vm2, %v3821_v48, 0.0 }
  0x69   : > { %v1015_v12 = vadd.f32 %v983_v27, %v885_v39  ;;  %v1761_v38 = vadd.f32 %v3301_v40, %v1725_v53  ;;  %v1465_v63 = vadd.f32 %v3355_v30, %v1365_v17  ;;  %v279_v37 = vadd.s32 208, %v3133_v2  ;;  %v5311_v30 = vld [vmem:[#allocation9_spill] sm:$0xff] }
  0x6a   : > { %v283_v29 = vadd.s32 240, %v3133_v2  ;;  %v3850_v19 = vmul.f32 %v3208_v34, %v1039_v20  ;;  %v1701_v23 = vmul.f32 %v3259_v61, %v1039_v20  ;;  %v1205_v36 = vadd.f32 %v3378_v47, %v1011_v43 }
  0x6b   : > { %v3854_v27 = vadd.f32 %v1177_v57, %v1015_v12  ;;  %2812 = vmatmul.msk.f32.gmra.mxu0 %vm1792_vm4, %v1761_v38  ;;  %v1565_v22 = vadd.f32 %v1533_v44, %v1465_v63  ;;  %v471_v32 = vand.u32 15, %v279_v37  ;;  %v3861_v39 = vmul.f32 %v3174_v13, %v949_v54  ;;  %v3877_v44 = vld [vmem:[%s3156_s10 + $0xf0] sm:$0xff]  ;;  %v740_v37 = vld [vmem:[%s3156_s10 + $0x38] sm:$0xff] }
  0x6c   : > { %v499_v1 = vand.u32 15, %v283_v29  ;;  %v1305_v42 = vadd.f32 %v1273_v26, %v1205_v36  ;;  %v3864_v20 = vmul.f32 %v3208_v34, %v1047_v25  ;;  %v1541_v47 = vmul.f32 %v3213_v35, %v1507_v11  ;;  %v1055_v36 = vld [vmem:[%s3156_s10 + $0xf2] sm:$0xff] }
  0x6d   : > { %5305 = vst [vmem:[#allocation48_spill] sm:$0xff] %v3854_v27  ;;  %v1633_v57 = vadd.f32 %v1601_v58, %v1565_v22  ;;  %v1609_v16 = vmul.f32 %v3234_v52, %v949_v54  ;;  %vm3868_vm7 = vcmp.gt.s32.totalorder %v471_v32, 0  ;;  %v957_v58 = vld [vmem:[%s3156_s10 + $0xf1] sm:$0xff]  ;;  %v1709_v29 = vmul.f32 %v3259_v61, %v1047_v25 }
  0x6e   : > { %vm3872_vm9 = vcmp.gt.s32.totalorder %v499_v1, 0  ;;  %v1373_v43 = vadd.f32 %v3424_v46, %v1305_v42  ;;  %v855_v12 = vsel %vm3868_vm7, %v3387_v9, 0.0  ;;  %v1247_v26 = vsel %vm3868_vm7, %v3401_v21, 0.0 }
  0x6f   : > { %v859_v54 = vsel %vm3872_vm9, %v3877_v44, 0.0  ;;  %v1733_v11 = vadd.f32 %v1701_v23, %v1633_v57  ;;  %v889_v38 = vmul.f32 %v3138_v3, %v855_v12  ;;  %v991_v46 = vmul.f32 %v3146_v6, %v957_v58  ;;  %v934_v57 = vld [vmem:[%s3156_s10 + $0x39] sm:$0xff] }
  0x70   : > { %v893_v63 = vmul.f32 %v3138_v3, %v859_v54  ;;  %v1473_v9 = vadd.f32 %v3427_v50, %v1373_v43  ;;  %v256_v22 = vadd.s32 24, %v3133_v2  ;;  %v870_v32 = vmul.f32 %v3138_v3, %v740_v37 }
  0x71   : > { %v1769_v1 = vadd.f32 %v3301_v40, %v1733_v11  ;;  %v1019_v21 = vadd.f32 %v3432_v5, %v889_v38  ;;  %v1185_v23 = vmul.f32 %v3151_v7, %v1055_v36  ;;  %v1281_v42 = vmul.f32 %v3165_v10, %v1247_v26 }
  0x72   : > { %v1573_v12 = vadd.f32 %v1541_v47, %v1473_v9  ;;  %v310_v25 = vand.u32 15, %v256_v22  ;;  %v968_v43 = vmul.f32 %v3146_v6, %v934_v57  ;;  %v1023_v3 = vadd.f32 %v991_v46, %v893_v63  ;;  %v5314_v9 = vld [vmem:[#allocation17_spill] sm:$0xff]  ;;  %v5315_v6 = vld [vmem:[#allocation20_spill] sm:$0xff] }
  0x73   : > { %2820 = vmatmul.msk.f32.gmra.mxu1 %vm1792_vm4, %v1769_v1  ;;  %v1213_v11 = vadd.f32 %v5311_v30, %v1019_v21  ;;  %v3911_v5 = vmul.f32 %v3174_v13, %v957_v58  ;;  %v1515_v47 = vsel %vm3868_vm7, %v3877_v44, 0.0  ;;  %v996_v22 = vadd.f32 %v5315_v6, %v5314_v9  ;;  %v5317_v21 = vld [vmem:[#allocation13_spill] sm:$0xff]  ;;  %v5318_v9 = vld [vmem:[#allocation11_spill] sm:$0xff] }
  0x74   : > { %v1641_v26 = vadd.f32 %v1609_v16, %v1573_v12  ;;  %vm3916_vm10 = vcmp.lt.s32.totalorder %v310_v25, 15  ;;  %v3922_v1 = vadd.f32 %v968_v43, %v870_v32  ;;  %v3925_v30 = vmul.f32 %v3208_v34, %v1055_v36  ;;  %v3936_v43 = vld [vmem:[%s3156_s10 + $0x3a] sm:$0xff] }
  0x75   : > { %v1313_v63 = vadd.f32 %v1281_v42, %v1213_v11  ;;  %v1617_v46 = vmul.f32 %v3234_v52, %v957_v58  ;;  %v1124_v53 = vsel %vm3916_vm10, %v5317_v21, 0.0  ;;  %v1549_v12 = vmul.f32 %v3213_v35, %v1515_v47  ;;  %v5319_v42 = vld [vmem:[#allocation18_spill] sm:$0xff]  ;;  %v5320_v47 = vld [vmem:[#allocation21_spill] sm:$0xff] }
  0x76   : > { %5316 = vst [vmem:[#allocation8_spill] sm:$0xff] %v3922_v1  ;;  %v1741_v16 = vadd.f32 %v1709_v29, %v1641_v26  ;;  %v1717_v25 = vmul.f32 %v3259_v61, %v1055_v36  ;;  %v1158_v50 = vmul.f32 %v3151_v7, %v1124_v53  ;;  %v1392_v11 = vsel %vm3916_vm10, %v5319_v42, 0.0  ;;  %v3945_v29 = vld [vmem:[%s5184_s1] ss:$0 sm:$0xff]  ;;  %v5322_v21 = vld [vmem:[#allocation25_spill] sm:$0xff] }
  0x77   : > { %v1381_v32 = vadd.f32 %v5318_v9, %v1313_v63  ;;  %v264_v58 = vadd.s32 88, %v3133_v2  ;;  %v874_v36 = vmul.f32 %v3945_v29, %v5320_v47  ;;  %v3950_v26 = vadd.f32 %v1185_v23, %v1023_v3  ;;  %v3955_v63 = vld [vmem:[%s5184_s1 + $0x1] ss:$0 sm:$0xff]  ;;  %v5323_v9 = vld [vmem:[#allocation12_spill] sm:$0xff] }
  0x78   : > { %v1777_v7 = vadd.f32 %v3301_v40, %v1741_v16  ;;  %v1190_v6 = vadd.f32 %v1158_v50, %v996_v22  ;;  %v972_v53 = vmul.f32 %v3955_v63, %v5322_v21  ;;  %v3961_v1 = vmul.f32 %v3165_v10, %v740_v37  ;;  %v5324_v50 = vld [vmem:[#allocation24_spill] sm:$0xff] }
  0x79   : > { %5321 = vst [vmem:[#allocation9_spill] sm:$0xff] %v3950_v26  ;;  %v1481_v31 = vadd.f32 %v5323_v9, %v1381_v32  ;;  %v3964_v16 = vmul.f32 %v3174_v13, %v934_v57  ;;  %v366_v23 = vand.u32 15, %v264_v58  ;;  %v1426_v22 = vmul.f32 %v3208_v34, %v1392_v11  ;;  %v748_v58 = vld [vmem:[%s3156_s10 + $0x78] sm:$0xff]  ;;  %v4013_v26 = vld [vmem:[%s5184_s1 + $0x4] ss:$0 sm:$0xff]  ;;  %v5338_v13 = vld [vmem:[#allocation32_spill] sm:$0xff] }
  0x7a   : > { %2828 = vmatmul.msk.f32.gmra.mxu2 %vm1792_vm4, %v1777_v7  ;;  %v1290_v3 = vadd.f32 %v5324_v50, %v1190_v6  ;;  %v1526_v47 = vmul.f32 %v3213_v35, %v740_v37  ;;  %v1660_v21 = vsel %vm3916_vm10, %v3936_v43, 0.0  ;;  %v1594_v10 = vmul.f32 %v3234_v52, %v934_v57  ;;  %v942_v7 = vld [vmem:[%s3156_s10 + $0x79] sm:$0xff]  ;;  %v5328_v37 = vld [vmem:[#allocation23_spill] sm:$0xff] }
  0x7b   : > { %v1581_v32 = vadd.f32 %v1549_v12, %v1481_v31  ;;  %vm3974_vm11 = vcmp.lt.s32.totalorder %v366_v23, 15  ;;  %v1004_v9 = vadd.f32 %v972_v53, %v874_v36  ;;  %v5327_v6 = vld [vmem:[#allocation30_spill] sm:$0xff]  ;;  %v878_v34 = vmul.f32 %v3945_v29, %v748_v58 }
  0x7c   : > { %v1358_v50 = vadd.f32 %v5327_v6, %v1290_v3  ;;  %v976_v35 = vmul.f32 %v3955_v63, %v942_v7  ;;  %v1132_v31 = vsel %vm3974_vm11, %v5328_v37, 0.0  ;;  %v1694_v57 = vmul.f32 %v3259_v61, %v1660_v21  ;;  %v3990_v12 = vld [vmem:[%s5184_s1 + $0x2] ss:$0 sm:$0xff]  ;;  %v3996_v36 = vld [vmem:[%s5184_s1 + $0x3] ss:$0 sm:$0xff]  ;;  %v4002_v3 = vld [vmem:[%s3156_s10 + $0x7a] sm:$0xff] }
  0x7d   : > { %v1649_v38 = vadd.f32 %v1617_v46, %v1581_v32  ;;  %v1166_v11 = vmul.f32 %v3990_v12, %v1132_v31  ;;  %v3999_v53 = vmul.f32 %v3996_v36, %v748_v58  ;;  %v5330_v46 = vld [vmem:[#allocation28_spill] sm:$0xff]  ;;  %v272_v32 = vadd.s32 152, %v3133_v2  ;;  %v5331_v6 = vld [vmem:[#allocation31_spill] sm:$0xff] }
  0x7e   : > { %v1458_v23 = vadd.f32 %v1426_v22, %v1358_v50  ;;  %v1400_v21 = vsel %vm3974_vm11, %v5330_v46, 0.0  ;;  %v882_v37 = vmul.f32 %v3945_v29, %v5331_v6  ;;  %v4016_v22 = vmul.f32 %v4013_v26, %v942_v7  ;;  %v5333_v50 = vld [vmem:[#allocation33_spill] sm:$0xff]  ;;  %v5335_v6 = vld [vmem:[#allocation35_spill] sm:$0xff] }
  0x7f   : > { %5329 = vst [vmem:[#allocation17_spill] sm:$0xff] %v3999_v53  ;;  %v1749_v31 = vadd.f32 %v1717_v25, %v1649_v38  ;;  %v1198_v27 = vadd.f32 %v1166_v11, %v1004_v9  ;;  %v980_v55 = vmul.f32 %v3955_v63, %v5333_v50  ;;  %v4020_v8 = vadd.f32 %v976_v35, %v878_v34  ;;  %v4025_v25 = vld [vmem:[%s5184_s1 + $0x6] ss:$0 sm:$0xff] }
  0x80   : > { %5332 = vst [vmem:[#allocation20_spill] sm:$0xff] %v4016_v22  ;;  %v1558_v59 = vadd.f32 %v1526_v47, %v1458_v23  ;;  %v1534_v9 = vmul.f32 %v4025_v25, %v748_v58  ;;  %v422_v38 = vand.u32 15, %v272_v32  ;;  %v4033_v22 = vld [vmem:[%s5184_s1 + $0x5] ss:$0 sm:$0xff]  ;;  %v1668_v34 = vsel %vm3974_vm11, %v4002_v3, 0.0  ;;  %v950_v32 = vld [vmem:[%s3156_s10 + $0xb9] sm:$0xff] }
  0x81   : > { %5334 = vst [vmem:[#allocation13_spill] sm:$0xff] %v4020_v8  ;;  %v1785_v11 = vadd.f32 %v3301_v40, %v1749_v31  ;;  %v1298_v53 = vadd.f32 %v5335_v6, %v1198_v27  ;;  %v1434_v47 = vmul.f32 %v4033_v22, %v1400_v21  ;;  %v1602_v58 = vmul.f32 %v3234_v52, %v942_v7  ;;  %v756_v27 = vld [vmem:[%s3156_s10 + $0xb8] sm:$0xff] }
  0x82   : > { %v1626_v35 = vadd.f32 %v1594_v10, %v1558_v59  ;;  %vm4040_vm12 = vcmp.lt.s32.totalorder %v422_v38, 15  ;;  %v1012_v31 = vadd.f32 %v980_v55, %v882_v37  ;;  %v886_v21 = vmul.f32 %v3945_v29, %v756_v27  ;;  %v4055_v7 = vld [vmem:[%s3156_s10 + $0xba] sm:$0xff] }
  0x83   : > { %2836 = vmatmul.msk.f32.gmra.mxu3 %vm1792_vm4, %v1785_v11  ;;  %v1366_v50 = vadd.f32 %v3653_v60, %v1298_v53  ;;  %v984_v6 = vmul.f32 %v3955_v63, %v950_v32  ;;  %v1140_v59 = vsel %vm4040_vm12, %v5338_v13, 0.0  ;;  %v1702_v10 = vmul.f32 %v3259_v61, %v1668_v34 }
  0x84   : > { %v1726_v52 = vadd.f32 %v1694_v57, %v1626_v35  ;;  %v1174_v38 = vmul.f32 %v3990_v12, %v1140_v59  ;;  %v4059_v55 = vmul.f32 %v3996_v36, %v756_v27  ;;  %v1408_v60 = vsel %vm4040_vm12, %v3643_v41, 0.0 }
  0x85   : > { %v1466_v37 = vadd.f32 %v1434_v47, %v1366_v50  ;;  %v280_v53 = vadd.s32 216, %v3133_v2  ;;  %v890_v57 = vmul.f32 %v3945_v29, %v3660_v18  ;;  %v4069_v34 = vmul.f32 %v4013_v26, %v950_v32 }
  0x86   : > { %v1762_v61 = vadd.f32 %v3301_v40, %v1726_v52  ;;  %v1206_v11 = vadd.f32 %v1174_v38, %v1012_v31  ;;  %v988_v35 = vmul.f32 %v3955_v63, %v3678_v0  ;;  %v4073_v50 = vadd.f32 %v984_v6, %v886_v21  ;;  %v4085_v0 = vld [vmem:[%s5184_s1 + $0x7] ss:$0 sm:$0xff]  ;;  %v4089_v21 = vld [vmem:[%s3156_s10 + $0xf8] sm:$0xff] }
  0x87   : > { %v1566_v47 = vadd.f32 %v1534_v9, %v1466_v37  ;;  %v1676_v13 = vsel %vm4040_vm12, %v4055_v7, 0.0  ;;  %v478_v59 = vand.u32 15, %v280_v53  ;;  %v1442_v18 = vmul.f32 %v4033_v22, %v1408_v60  ;;  %v5343_v38 = vld [vmem:[#allocation41_spill] sm:$0xff] }
  0x88   : > { %5339 = vst [vmem:[#allocation11_spill] sm:$0xff] %v4073_v50  ;;  %2813 = vmatmul.msk.f32.gmra.mxu0 %vm1792_vm4, %v1762_v61  ;;  %v1306_v40 = vadd.f32 %v3656_v33, %v1206_v11  ;;  %v1542_v31 = vmul.f32 %v4025_v25, %v756_v27  ;;  %v1610_v9 = vmul.f32 %v4085_v0, %v950_v32  ;;  %v5342_v27 = vsel %vm3176_vm1, %v3720_v4, 0.0  ;;  %v4104_v32 = vld [vmem:[%s5184_s1 + $0x8] ss:$0 sm:$0xff]  ;;  %v4112_v53 = vld [vmem:[%s3156_s10 + $0xf9] sm:$0xff] }
  0x89   : > { %v1634_v23 = vadd.f32 %v1602_v58, %v1566_v47  ;;  %vm4091_vm13 = vcmp.lt.s32.totalorder %v478_v59, 15  ;;  %v1020_v33 = vadd.f32 %v988_v35, %v890_v57  ;;  %v1259_v52 = vmul.f32 %v3996_v36, %v5342_v27  ;;  %v5344_v57 = vld [vmem:[#allocation40_spill] sm:$0xff]  ;;  %v4153_v50 = vld [vmem:[%s3156_s10 + $0x80] sm:$0xff] }
  0x8a   : > { %v1374_v37 = vadd.f32 %v5343_v38, %v1306_v40  ;;  %v1710_v58 = vmul.f32 %v4104_v32, %v1676_v13  ;;  %v4109_v60 = vmul.f32 %v3945_v29, %v4089_v21  ;;  %v1148_v4 = vsel %vm4091_vm13, %v5344_v57, 0.0  ;;  %v4125_v29 = vld [vmem:[%s3156_s10 + $0xfa] sm:$0xff]  ;;  %5347 = vst [vmem:[#allocation18_spill] sm:$0xff] %v4153_v50 }
  0x8b   : > { %v1734_v61 = vadd.f32 %v1702_v10, %v1634_v23  ;;  %v4119_v11 = vmul.f32 %v3955_v63, %v4112_v53  ;;  %v1182_v35 = vmul.f32 %v3990_v12, %v1148_v4  ;;  %v1550_v47 = vmul.f32 %v4025_v25, %v4089_v21  ;;  %v5345_v40 = vld [vmem:[#allocation2_spill] sm:$0xff] }
  0x8c   : > { %v1474_v13 = vadd.f32 %v1442_v18, %v1374_v37  ;;  %v1416_v59 = vsel %vm4091_vm13, %v3695_v24, 0.0  ;;  %v1291_v27 = vadd.f32 %v1259_v52, %v5345_v40  ;;  %v4132_v10 = vld [vmem:[%s3156_s10 + $0x40] sm:$0xff]  ;;  %v1618_v37 = vmul.f32 %v4085_v0, %v4112_v53 }
  0x8d   : > { %v1493_v63 = vsel %vm3176_vm1, %v4132_v10, 0.0  ;;  %v4140_v23 = vld [vmem:[%s5185_s2] ss:$0 sm:$0xff]  ;;  %v1214_v38 = vadd.f32 %v1182_v35, %v1020_v33  ;;  %v5346_v14 = vsel %vm3246_vm3, %v3773_v49, 0.0  ;;  %v1501_v33 = vsel %vm3246_vm3, %v4153_v50, 0.0 }
  0x8e   : > { %v1770_v18 = vadd.f32 %v4140_v23, %v1734_v61  ;;  %v1527_v52 = vmul.f32 %v4025_v25, %v1493_v63  ;;  %v1574_v57 = vadd.f32 %v1542_v31, %v1474_v13  ;;  %v1359_v4 = vadd.f32 %v3757_v45, %v1291_v27  ;;  %v5348_v61 = vld [vmem:[#allocation42_spill] sm:$0xff]  ;;  %v5349_v63 = vld [vmem:[#allocation3_spill] sm:$0xff] }
  0x8f   : > { %v1267_v40 = vmul.f32 %v3996_v36, %v5346_v14  ;;  %v1314_v35 = vadd.f32 %v5348_v61, %v1214_v38  ;;  %v1450_v31 = vmul.f32 %v4033_v22, %v1416_v59  ;;  %v1684_v45 = vsel %vm4091_vm13, %v4125_v29, 0.0  ;;  %v4165_v13 = vld [vmem:[%s3156_s10 + $0x41] sm:$0xff] }
  0x90   : > { %2821 = vmatmul.msk.f32.gmra.mxu1 %vm1792_vm4, %v1770_v18  ;;  %v1595_v49 = vmul.f32 %v4165_v13, %v4085_v0  ;;  %v1642_v27 = vadd.f32 %v1610_v9, %v1574_v57  ;;  %v1459_v56 = vadd.f32 %v3760_v51, %v1359_v4  ;;  %v5350_v18 = vsel %vm3324_vm6, %v3821_v48, 0.0  ;;  %v4178_v38 = vld [vmem:[%s3156_s10 + $0x42] sm:$0xff] }
  0x91   : > { %v1299_v14 = vadd.f32 %v1267_v40, %v5349_v63  ;;  %v1275_v59 = vmul.f32 %v3996_v36, %v5350_v18  ;;  %v1382_v6 = vadd.f32 %v3747_v15, %v1314_v35  ;;  %v1695_v61 = vmul.f32 %v4178_v38, %v4104_v32  ;;  %v5351_v57 = vld [vmem:[#allocation7_spill] sm:$0xff]  ;;  %v5352_v63 = vld [vmem:[#allocation5_spill] sm:$0xff] }
  0x92   : > { %v1535_v9 = vmul.f32 %v4025_v25, %v1501_v33  ;;  %v1509_v51 = vsel %vm3324_vm6, %v5351_v57, 0.0  ;;  %v1742_v4 = vadd.f32 %v1710_v58, %v1642_v27  ;;  %v1559_v40 = vadd.f32 %v1527_v52, %v1459_v56  ;;  %v4189_v35 = vld [vmem:[%s3156_s10 + $0x81] sm:$0xff] }
  0x93   : > { %v1367_v48 = vadd.f32 %v3806_v28, %v1299_v14  ;;  %v1307_v18 = vadd.f32 %v1275_v59, %v5352_v63  ;;  %v1482_v15 = vadd.f32 %v1450_v31, %v1382_v6  ;;  %v1603_v8 = vmul.f32 %v4189_v35, %v4085_v0  ;;  %v1219_v27 = vld [vmem:[%s3156_s10 + $0x100] sm:$0xff] }
  0x94   : > { %v1543_v50 = vmul.f32 %v4025_v25, %v1509_v51  ;;  %v5353_v62 = vsel %vm3396_vm8, %v3877_v44, 0.0  ;;  %v1778_v52 = vadd.f32 %v4140_v23, %v1742_v4  ;;  %v1627_v28 = vadd.f32 %v1595_v49, %v1559_v40  ;;  %v4205_v59 = vld [vmem:[%s3156_s10 + $0x82] sm:$0xff]  ;;  %v5355_v4 = vld [vmem:[#allocation4_spill] sm:$0xff] }
  0x95   : > { %v1283_v58 = vmul.f32 %v3996_v36, %v5353_v62  ;;  %v1467_v33 = vadd.f32 %v3850_v19, %v1367_v48  ;;  %v1375_v31 = vadd.f32 %v3861_v39, %v1307_v18  ;;  %v1582_v56 = vadd.f32 %v1550_v47, %v1482_v15  ;;  %v5354_v6 = vld [vmem:[#allocation10_spill] sm:$0xff] }
  0x96   : > { %v1718_v14 = vmul.f32 %v4104_v32, %v1684_v45  ;;  %v1703_v44 = vmul.f32 %v4205_v59, %v4104_v32  ;;  %2829 = vmatmul.msk.f32.gmra.mxu2 %vm1792_vm4, %v1778_v52  ;;  %v1727_v51 = vadd.f32 %v1695_v61, %v1627_v28  ;;  %v1611_v39 = vmul.f32 %v4085_v0, %v5355_v4  ;;  %v1319_v40 = vld [vmem:[%s3156_s10 + $0x101] sm:$0xff] }
  0x97   : > { %v1315_v57 = vadd.f32 %v1283_v58, %v5354_v6  ;;  %v1567_v49 = vadd.f32 %v1535_v9, %v1467_v33  ;;  %v1475_v19 = vadd.f32 %v3864_v20, %v1375_v31  ;;  %v1650_v47 = vadd.f32 %v1618_v37, %v1582_v56  ;;  %v5356_v48 = vld [vmem:[#allocation6_spill] sm:$0xff] }
  0x98   : > { %v1711_v45 = vmul.f32 %v4104_v32, %v5356_v48  ;;  %v1387_v18 = vld [vmem:[%s3156_s10 + $0x102] sm:$0xff]  ;;  %v1517_v15 = vsel %vm3396_vm8, %v1219_v27, 0.0  ;;  %v1763_v62 = vadd.f32 %v4140_v23, %v1727_v51  ;;  %v1619_v37 = vmul.f32 %v4085_v0, %v1319_v40 }
  0x99   : > { %v1383_v63 = vadd.f32 %v3911_v5, %v1315_v57  ;;  %v1635_v61 = vadd.f32 %v1603_v8, %v1567_v49  ;;  %v1575_v9 = vadd.f32 %v1543_v50, %v1475_v19  ;;  %v1551_v20 = vmul.f32 %v4025_v25, %v1517_v15 }
  0x9a   : > { %v1750_v58 = vadd.f32 %v1718_v14, %v1650_v47  ;;  %v258_v28 = vadd.s32 40, %v3133_v2  ;;  %2814 = vmatmul.msk.f32.gmra.mxu0 %vm1792_vm4, %v1763_v62  ;;  %v1251_v54 = vsel %vm3872_vm9, %v1219_v27, 0.0  ;;  %v1719_v31 = vmul.f32 %v4104_v32, %v1387_v18  ;;  %v5362_v62 = vld [vmem:[#allocation14_spill] sm:$0xff] }
  0x9b   : > { %v1483_v52 = vadd.f32 %v3925_v30, %v1383_v63  ;;  %v1735_v5 = vadd.f32 %v1703_v44, %v1635_v61  ;;  %v1643_v33 = vadd.f32 %v1611_v39, %v1575_v9  ;;  %v266_v14 = vadd.s32 104, %v3133_v2  ;;  %v5359_v63 = vld [vmem:[#allocation15_spill] sm:$0xff]  ;;  %v5363_v9 = vld [vmem:[#allocation16_spill] sm:$0xff] }
  0x9c   : > { %v1786_v8 = vadd.f32 %v4140_v23, %v1750_v58  ;;  %v324_v56 = vand.u32 15, %v258_v28  ;;  %v4234_v30 = vmul.f32 %v3996_v36, %v4089_v21  ;;  %v4238_v6 = vmul.f32 %v4013_v26, %v4112_v53 }
  0x9d   : > { %v1583_v50 = vadd.f32 %v1551_v20, %v1483_v52  ;;  %v1771_v44 = vadd.f32 %v4140_v23, %v1735_v5  ;;  %v1743_v57 = vadd.f32 %v1711_v45, %v1643_v33  ;;  %v380_v49 = vand.u32 15, %v266_v14  ;;  %v5364_v52 = vld [vmem:[#allocation19_spill] sm:$0xff]  ;;  %v5365_v5 = vld [vmem:[#allocation26_spill] sm:$0xff] }
  0x9e   : > { %2837 = vmatmul.msk.f32.gmra.mxu3 %vm1792_vm4, %v1786_v8  ;;  %vm4242_vm1 = vcmp.lt.s32.totalorder %v324_v56, 15  ;;  %v274_v19 = vadd.s32 168, %v3133_v2  ;;  %v4249_v21 = vadd.f32 %v4119_v11, %v4109_v60  ;;  %v4254_v4 = vmul.f32 %v3996_v36, %v1251_v54  ;;  %v5368_v56 = vld [vmem:[#allocation22_spill] sm:$0xff] }
  0x9f   : > { %v1651_v27 = vadd.f32 %v1619_v37, %v1583_v50  ;;  %2822 = vmatmul.msk.f32.gmra.mxu1 %vm1792_vm4, %v1771_v44  ;;  %v1779_v53 = vadd.f32 %v4140_v23, %v1743_v57  ;;  %v1126_v39 = vsel %vm4242_vm1, %v5319_v42, 0.0  ;;  %v4260_v47 = vmul.f32 %v4013_v26, %v1319_v40  ;;  %v5369_v44 = vld [vmem:[#allocation27_spill] sm:$0xff] }
  0xa0   : > { %v4263_v48 = vmul.f32 %v4033_v22, %v1387_v18  ;;  %v1160_v60 = vmul.f32 %v3990_v12, %v1126_v39  ;;  %v1394_v11 = vsel %vm4242_vm1, %v3936_v43, 0.0  ;;  %v1528_v15 = vmul.f32 %v4025_v25, %v5359_v63  ;;  %v5371_v39 = vld [vmem:[#allocation17_spill] sm:$0xff] }
  0xa1   : > { %v1751_v45 = vadd.f32 %v1719_v31, %v1651_v27  ;;  %2830 = vmatmul.msk.f32.gmra.mxu2 %vm1792_vm4, %v1779_v53  ;;  %vm4272_vm3 = vcmp.lt.s32.totalorder %v380_v49, 15  ;;  %v436_v40 = vand.u32 15, %v274_v19  ;;  %v1596_v20 = vmul.f32 %v4085_v0, %v5363_v9  ;;  %v5370_v19 = vld [vmem:[#allocation36_spill] sm:$0xff] }
  0xa2   : > { %v1192_v61 = vadd.f32 %v1160_v60, %v5362_v62  ;;  %v1134_v58 = vsel %vm4272_vm3, %v5330_v46, 0.0  ;;  %v1662_v37 = vsel %vm4242_vm1, %v5364_v52, 0.0  ;;  %v1536_v33 = vmul.f32 %v4025_v25, %v5365_v5  ;;  %v5375_v52 = vld [vmem:[#allocation20_spill] sm:$0xff] }
  0xa3   : > { %v1787_v18 = vadd.f32 %v4140_v23, %v1751_v45  ;;  %v1168_v28 = vmul.f32 %v3990_v12, %v1134_v58  ;;  %vm4289_vm6 = vcmp.lt.s32.totalorder %v436_v40, 15  ;;  %v1428_v8 = vmul.f32 %v4033_v22, %v1394_v11  ;;  %v5372_v11 = vld [vmem:[#allocation29_spill] sm:$0xff]  ;;  %v5373_v40 = vld [vmem:[#allocation34_spill] sm:$0xff] }
  0xa4   : > { %v1292_v31 = vadd.f32 %v3961_v1, %v1192_v61  ;;  %v1402_v46 = vsel %vm4272_vm3, %v4002_v3, 0.0  ;;  %v1142_v50 = vsel %vm4289_vm6, %v3643_v41, 0.0  ;;  %v1604_v57 = vmul.f32 %v4085_v0, %v5369_v44  ;;  %v5374_v61 = vld [vmem:[#allocation38_spill] sm:$0xff] }
  0xa5   : > { %v1200_v14 = vadd.f32 %v1168_v28, %v5368_v56  ;;  %v1176_v27 = vmul.f32 %v3990_v12, %v1142_v50  ;;  %v1410_v1 = vsel %vm4289_vm6, %v4055_v7, 0.0  ;;  %v1696_v49 = vmul.f32 %v4104_v32, %v1662_v37  ;;  %v5377_v50 = vld [vmem:[#allocation37_spill] sm:$0xff] }
  0xa6   : > { %2838 = vmatmul.msk.f32.gmra.mxu3 %vm1792_vm4, %v1787_v18  ;;  %v1360_v51 = vadd.f32 %v3964_v16, %v1292_v31  ;;  %v1544_v41 = vmul.f32 %v4025_v25, %v5370_v19  ;;  %v282_v53 = vadd.s32 232, %v3133_v2  ;;  %v1436_v60 = vmul.f32 %v4033_v22, %v1402_v46 }
  0xa7   : > { %v1300_v45 = vadd.f32 %v5371_v39, %v1200_v14  ;;  %v1670_v63 = vsel %vm4272_vm3, %v5372_v11, 0.0  ;;  %v1208_v62 = vadd.f32 %v1176_v27, %v5373_v40  ;;  %v1444_v16 = vmul.f32 %v4033_v22, %v1410_v1  ;;  %v1220_v27 = vld [vmem:[%s3156_s10 + $0x108] sm:$0xff] }
  0xa8   : > { %v1460_v18 = vadd.f32 %v1428_v8, %v1360_v51  ;;  %v1678_v9 = vsel %vm4289_vm6, %v5374_v61, 0.0  ;;  %v492_v58 = vand.u32 15, %v282_v53  ;;  %v284_v5 = vadd.s32 248, %v3133_v2  ;;  %v4343_v1 = vld [vmem:[%s3156_s10 + $0x109] sm:$0xff] }
  0xa9   : > { %v1368_v37 = vadd.f32 %v5375_v52, %v1300_v45  ;;  %v1308_v28 = vadd.f32 %v4059_v55, %v1208_v62  ;;  %v1227_v31 = vsel %vm3715_vm14, %v4132_v10, 0.0  ;;  %v1704_v8 = vmul.f32 %v4104_v32, %v1670_v63  ;;  %v5380_v11 = vld [vmem:[#allocation39_spill] sm:$0xff] }
  0xaa   : > { %v1560_v46 = vadd.f32 %v1528_v15, %v1460_v18  ;;  %v1612_v56 = vmul.f32 %v4085_v0, %v5377_v50  ;;  %vm4333_vm8 = vcmp.lt.s32.totalorder %v492_v58, 15  ;;  %v1261_v10 = vmul.f32 %v3996_v36, %v1227_v31  ;;  %v4359_v61 = vld [vmem:[%s3156_s10 + $0x10a] sm:$0xff] }
  0xab   : > { %v1468_v14 = vadd.f32 %v1436_v60, %v1368_v37  ;;  %v1376_v44 = vadd.f32 %v4069_v34, %v1308_v28  ;;  %v1150_v55 = vsel %vm4333_vm8, %v3695_v24, 0.0  ;;  %v1712_v51 = vmul.f32 %v4104_v32, %v1678_v9 }
  0xac   : > { %v1628_v15 = vadd.f32 %v1596_v20, %v1560_v46  ;;  %v1184_v19 = vmul.f32 %v3990_v12, %v1150_v55  ;;  %v1418_v53 = vsel %vm4333_vm8, %v4125_v29, 0.0  ;;  %v506_v45 = vand.u32 15, %v284_v5  ;;  %v3045_v5 = vld [vmem:[%s3156_s10 + $0x50] sm:$0xff] }
  0xad   : > { %v1568_v34 = vadd.f32 %v1536_v33, %v1468_v14  ;;  %v1476_v39 = vadd.f32 %v1444_v16, %v1376_v44  ;;  %v4352_v24 = vmul.f32 %v3996_v36, %v1220_v27  ;;  %v1552_v20 = vmul.f32 %v4025_v25, %v1220_v27  ;;  %v5381_v16 = vld [vmem:[#allocation44_spill] sm:$0xff]  ;;  %v5384_v14 = vld [vmem:[#allocation18_spill] sm:$0xff] }
  0xae   : > { %v1728_v60 = vadd.f32 %v1696_v49, %v1628_v15  ;;  %v1216_v63 = vadd.f32 %v1184_v19, %v5380_v11  ;;  %v1620_v40 = vmul.f32 %v4085_v0, %v4343_v1  ;;  %v1452_v33 = vmul.f32 %v4033_v22, %v1418_v53  ;;  %v3047_v19 = vld [vmem:[%s3156_s10 + $0x52] sm:$0xff]  ;;  %v5386_v11 = vld [vmem:[#allocation46_spill] sm:$0xff] }
  0xaf   : > { %v1636_v62 = vadd.f32 %v1604_v57, %v1568_v34  ;;  %v1576_v18 = vadd.f32 %v1544_v41, %v1476_v39  ;;  %v1293_v9 = vadd.f32 %v1261_v10, %v5381_v16  ;;  %v1329_v52 = vmul.f32 %v4165_v13, %v4013_v26  ;;  %v3048_v34 = vld [vmem:[%s3156_s10 + $0x90] sm:$0xff] }
  0xb0   : > { %v1764_v58 = vadd.f32 %v4140_v23, %v1728_v60  ;;  %v1316_v49 = vadd.f32 %v4234_v30, %v1216_v63  ;;  %v1429_v37 = vmul.f32 %v4178_v38, %v4033_v22  ;;  %vm4369_vm15 = vcmp.lt.s32.totalorder %v506_v45, 15  ;;  %v1587_v44 = vld [vmem:[%s3156_s10 + $0x111] sm:$0xff] }
  0xb1   : > { %v1736_v28 = vadd.f32 %v1704_v8, %v1636_v62  ;;  %v1644_v57 = vadd.f32 %v1612_v56, %v1576_v18  ;;  %v1495_v31 = vsel %vm3715_vm14, %v3045_v5, 0.0  ;;  %v1686_v13 = vsel %vm4333_vm8, %v4359_v61, 0.0  ;;  %v3046_v56 = vld [vmem:[%s3156_s10 + $0x51] sm:$0xff]  ;;  %v3049_v18 = vld [vmem:[%s3156_s10 + $0xc0] sm:$0xff] }
  0xb2   : > { %2815 = vmatmul.msk.f32.gmra.mxu0 %vm1792_vm4, %v1764_v58  ;;  %v1384_v30 = vadd.f32 %v4238_v6, %v1316_v49  ;;  %v1361_v38 = vadd.f32 %v1329_v52, %v1293_v9  ;;  %v1529_v46 = vmul.f32 %v4025_v25, %v1495_v31  ;;  %v1597_v42 = vmul.f32 %v3046_v56, %v4085_v0  ;;  %v3050_v9 = vld [vmem:[%s3156_s10 + $0xc1] sm:$0xff]  ;;  %v3051_v58 = vld [vmem:[%s3156_s10 + $0xd0] sm:$0xff] }
  0xb3   : > { %v1772_v8 = vadd.f32 %v4140_v23, %v1736_v28  ;;  %v1744_v50 = vadd.f32 %v1712_v51, %v1644_v57  ;;  %v1235_v55 = vsel %vm3768_vm0, %v5384_v14, 0.0  ;;  %v1337_v10 = vmul.f32 %v4189_v35, %v4013_v26  ;;  %v1487_v57 = vld [vmem:[%s3156_s10 + $0x110] sm:$0xff] }
  0xb4   : > { %v1484_v6 = vadd.f32 %v1452_v33, %v1384_v30  ;;  %v1461_v27 = vadd.f32 %v1429_v37, %v1361_v38  ;;  %v1269_v54 = vmul.f32 %v3996_v36, %v1235_v55  ;;  %v1720_v51 = vmul.f32 %v4104_v32, %v1686_v13  ;;  %v3052_v31 = vld [vmem:[%s3156_s10 + $0x91] sm:$0xff]  ;;  %v3053_v13 = vld [vmem:[%s3156_s10 + $0xc2] sm:$0xff] }
  0xb5   : > { %2823 = vmatmul.msk.f32.gmra.mxu1 %vm1792_vm4, %v1772_v8  ;;  %v1780_v15 = vadd.f32 %v4140_v23, %v1744_v50  ;;  %v1697_v53 = vmul.f32 %v3047_v19, %v4104_v32  ;;  %v1503_v39 = vsel %vm3768_vm0, %v3048_v34, 0.0  ;;  %v1437_v63 = vmul.f32 %v4205_v59, %v4033_v22  ;;  %v3054_v55 = vld [vmem:[%s3156_s10 + $0x92] sm:$0xff] }
  0xb6   : > { %v1584_v45 = vadd.f32 %v1552_v20, %v1484_v6  ;;  %v1561_v60 = vadd.f32 %v1529_v46, %v1461_v27  ;;  %v1301_v35 = vadd.f32 %v1269_v54, %v5386_v11  ;;  %v1537_v62 = vmul.f32 %v4025_v25, %v1503_v39  ;;  %v5388_v46 = vld [vmem:[#allocation9_spill] sm:$0xff] }
  0xb7   : > { %2831 = vmatmul.msk.f32.gmra.mxu2 %vm1792_vm4, %v1780_v15  ;;  %v1243_v16 = vsel %vm3816_vm5, %v3049_v18, 0.0  ;;  %v1345_v20 = vmul.f32 %v3050_v9, %v4013_v26  ;;  %v1511_v49 = vsel %vm3816_vm5, %v3051_v58, 0.0  ;;  %v1152_v5 = vsel %vm4369_vm15, %v4125_v29, 0.0  ;;  %v1655_v19 = vld [vmem:[%s3156_s10 + $0x112] sm:$0xff] }
  0xb8   : > { %v1652_v52 = vadd.f32 %v1620_v40, %v1584_v45  ;;  %v1629_v59 = vadd.f32 %v1597_v42, %v1561_v60  ;;  %v1369_v37 = vadd.f32 %v1337_v10, %v1301_v35  ;;  %v1277_v28 = vmul.f32 %v3996_v36, %v1243_v16  ;;  %v5389_v42 = vld [vmem:[#allocation48_spill] sm:$0xff] }
  0xb9   : > { %v1605_v30 = vmul.f32 %v3052_v31, %v4085_v0  ;;  %v1445_v38 = vmul.f32 %v3053_v13, %v4033_v22  ;;  %v1317_v40 = vadd.f32 %v4254_v4, %v5388_v46  ;;  %v1705_v6 = vmul.f32 %v3054_v55, %v4104_v32  ;;  %v3055_v60 = vld [vmem:[%s3156_s10 + $0xd1] sm:$0xff] }
  0xba   : > { %v1752_v8 = vadd.f32 %v1720_v51, %v1652_v52  ;;  %v1729_v50 = vadd.f32 %v1697_v53, %v1629_v59  ;;  %v1469_v56 = vadd.f32 %v1437_v63, %v1369_v37  ;;  %v1309_v14 = vadd.f32 %v1277_v28, %v5389_v42  ;;  %v3056_v9 = vld [vmem:[%s3156_s10 + $0xd2] sm:$0xff] }
  0xbb   : > { %v1545_v29 = vmul.f32 %v4025_v25, %v1511_v49  ;;  %v1385_v27 = vadd.f32 %v4260_v47, %v1317_v40  ;;  %v1519_v54 = vsel %vm3872_vm9, %v1487_v57, 0.0  ;;  %v1621_v39 = vmul.f32 %v4085_v0, %v1587_v44  ;;  %v5394_v44 = vld [vmem:[#allocation8_spill] sm:$0xff]  ;;  %v3068_v59 = vld [vmem:[%s3156_s10 + $0x99] sm:$0xff] }
  0xbc   : > { %v1788_v10 = vadd.f32 %v4140_v23, %v1752_v8  ;;  %v1765_v4 = vadd.f32 %v4140_v23, %v1729_v50  ;;  %v1569_v15 = vadd.f32 %v1537_v62, %v1469_v56  ;;  %v1377_v51 = vadd.f32 %v1345_v20, %v1309_v14  ;;  %v3059_v8 = vld [vmem:[%s3156_s10 + $0x4a] sm:$0xff]  ;;  %v1588_v42 = vld [vmem:[%s3156_s10 + $0x119] sm:$0xff] }
  0xbd   : > { %v1485_v53 = vadd.f32 %v4263_v48, %v1385_v27  ;;  %v1553_v34 = vmul.f32 %v4025_v25, %v1519_v54  ;;  %v260_v45 = vadd.s32 56, %v3133_v2  ;;  %v1613_v11 = vmul.f32 %v3055_v60, %v4085_v0  ;;  %v5395_v60 = vld [vmem:[#allocation13_spill] sm:$0xff] }
  0xbe   : > { %2839 = vmatmul.msk.f32.gmra.mxu3 %vm1792_vm4, %v1788_v10  ;;  %2816 = vmatmul.msk.f32.gmra.mxu0 %vm1792_vm4, %v1765_v4  ;;  %v1637_v17 = vadd.f32 %v1605_v30, %v1569_v15  ;;  %v1477_v47 = vadd.f32 %v1445_v38, %v1377_v51  ;;  %v268_v35 = vadd.s32 120, %v3133_v2  ;;  %v1420_v48 = vsel %vm4369_vm15, %v4359_v61, 0.0  ;;  %v3057_v30 = vld [vmem:[%s3156_s10 + $0x48] sm:$0xff]  ;;  %v3062_v10 = vld [vmem:[%s3156_s10 + $0x5a] sm:$0xff] }
  0xbf   : > { %v1585_v63 = vadd.f32 %v1553_v34, %v1485_v53  ;;  %v1721_v62 = vmul.f32 %v4104_v32, %v1655_v19  ;;  %v338_v18 = vand.u32 15, %v260_v45  ;;  %v1713_v20 = vmul.f32 %v3056_v9, %v4104_v32  ;;  %v3058_v38 = vld [vmem:[%s3156_s10 + $0x49] sm:$0xff]  ;;  %v4497_v53 = vld [vmem:[%s5187_s4] ss:$0 sm:$0xff] }
  0xc0   : > { %v1737_v33 = vadd.f32 %v1705_v6, %v1637_v17  ;;  %v1577_v16 = vadd.f32 %v1545_v29, %v1477_v47  ;;  %v394_v58 = vand.u32 15, %v268_v35  ;;  %v1186_v49 = vmul.f32 %v3990_v12, %v1152_v5  ;;  %v3061_v6 = vld [vmem:[%s3156_s10 + $0x59] sm:$0xff]  ;;  %v3063_v51 = vld [vmem:[%s3156_s10 + $0x88] sm:$0xff]  ;;  %v1906_v47 = vpop.f32.mrf.mxu0 }
  0xc1   : > { %v4452_v52 = vmul.f32 %v4013_v26, %v4343_v1  ;;  %v1653_v61 = vadd.f32 %v1621_v39, %v1585_v63  ;;  %vm4454_vm14 = vcmp.lt.s32.totalorder %v338_v18, 15  ;;  %v4459_v37 = vmul.f32 %v4033_v22, %v1420_v48  ;;  %v3064_v39 = vld [vmem:[%s3156_s10 + $0x8a] sm:$0xff]  ;;  %v3066_v63 = vld [vmem:[%s3156_s10 + $0x98] sm:$0xff] }
  0xc2   : > { %v1773_v28 = vadd.f32 %v4140_v23, %v1737_v33  ;;  %v1645_v57 = vadd.f32 %v1613_v11, %v1577_v16  ;;  %v1128_v5 = vsel %vm4454_vm14, %v3936_v43, 0.0  ;;  %v1262_v13 = vmul.f32 %v3057_v30, %v3996_v36  ;;  %v3060_v43 = vld [vmem:[%s3156_s10 + $0x58] sm:$0xff]  ;;  %v3065_v35 = vld [vmem:[%s3156_s10 + $0x89] sm:$0xff] }
  0xc3   : > { %v1753_v31 = vadd.f32 %v1721_v62, %v1653_v61  ;;  %v1162_v1 = vmul.f32 %v3990_v12, %v1128_v5  ;;  %v1330_v46 = vmul.f32 %v3058_v38, %v4013_v26  ;;  %v1396_v50 = vsel %vm4454_vm14, %v3059_v8, 0.0  ;;  %v3067_v18 = vld [vmem:[%s3156_s10 + $0x9a] sm:$0xff] }
  0xc4   : > { %2824 = vmatmul.msk.f32.gmra.mxu1 %vm1792_vm4, %v1773_v28  ;;  %v1745_v40 = vadd.f32 %v1713_v20, %v1645_v57  ;;  %v1530_v56 = vmul.f32 %v3060_v43, %v4025_v25  ;;  %vm4476_vm0 = vcmp.lt.s32.totalorder %v394_v58, 15  ;;  %v1598_v29 = vmul.f32 %v3061_v6, %v4085_v0  ;;  %v1488_v57 = vld [vmem:[%s3156_s10 + $0x118] sm:$0xff] }
  0xc5   : > { %v1789_v14 = vadd.f32 %v4140_v23, %v1753_v31  ;;  %v1194_v55 = vadd.f32 %v1162_v1, %v5394_v44  ;;  %v1136_v27 = vsel %vm4476_vm0, %v4002_v3, 0.0  ;;  %v1664_v4 = vsel %vm4454_vm14, %v3062_v10, 0.0  ;;  %v1656_v5 = vld [vmem:[%s3156_s10 + $0x11a] sm:$0xff] }
  0xc6   : > { %v1781_v54 = vadd.f32 %v4140_v23, %v1745_v40  ;;  %v1170_v15 = vmul.f32 %v3990_v12, %v1136_v27  ;;  %v1270_v19 = vmul.f32 %v3063_v51, %v3996_v36  ;;  %v1430_v34 = vmul.f32 %v4033_v22, %v1396_v50  ;;  %v4525_v1 = vld [vmem:[%s5188_s5] ss:$0 sm:$0xff]  ;;  %v3069_v40 = vld [vmem:[%s3156_s10 + $0xc8] sm:$0xff] }
  0xc7   : > { %2840 = vmatmul.msk.f32.gmra.mxu3 %vm1792_vm4, %v1789_v14  ;;  %v1294_v3 = vadd.f32 %v1262_v13, %v1194_v55  ;;  %v1404_v45 = vsel %vm4476_vm0, %v3064_v39, 0.0  ;;  %v276_v17 = vadd.s32 184, %v3133_v2  ;;  %v1338_v48 = vmul.f32 %v3065_v35, %v4013_v26  ;;  %v3070_v50 = vld [vmem:[%s3156_s10 + $0xc9] sm:$0xff]  ;;  %v3072_v35 = vld [vmem:[%s3156_s10 + $0xd8] sm:$0xff] }
  0xc8   : > { %2832 = vmatmul.msk.f32.gmra.mxu2 %vm1792_vm4, %v1781_v54  ;;  %v1202_v11 = vadd.f32 %v1170_v15, %v5395_v60  ;;  %v1538_v62 = vmul.f32 %v3066_v63, %v4025_v25  ;;  %v1672_v33 = vsel %vm4476_vm0, %v3067_v18, 0.0  ;;  %v1698_v2 = vmul.f32 %v4104_v32, %v1664_v4  ;;  %v3071_v27 = vld [vmem:[%s3156_s10 + $0xca] sm:$0xff] }
  0xc9   : > { %v1362_v16 = vadd.f32 %v1330_v46, %v1294_v3  ;;  %v450_v9 = vand.u32 15, %v276_v17  ;;  %v1218_v20 = vadd.f32 %v1186_v49, %v4249_v21  ;;  %v1438_v61 = vmul.f32 %v4033_v22, %v1404_v45  ;;  %v1954_v45 = vpop.f32.mrf.mxu2 }
  0xca   : > { %v1302_v58 = vadd.f32 %v1270_v19, %v1202_v11  ;;  %v1606_v28 = vmul.f32 %v3068_v59, %v4085_v0  ;;  %v2006_v31 = vmul.f32 %v4497_v53, %v1906_v47  ;;  %v1706_v21 = vmul.f32 %v4104_v32, %v1672_v33 }
  0xcb   : > { %v1462_v30 = vadd.f32 %v1430_v34, %v1362_v16  ;;  %vm4528_vm2 = vcmp.lt.s32.totalorder %v450_v9, 15  ;;  %v1318_v13 = vadd.f32 %v4352_v24, %v1218_v20  ;;  %v1278_v8 = vmul.f32 %v3069_v40, %v3996_v36  ;;  %v3074_v20 = vld [vmem:[%s3156_s10 + $0xd9] sm:$0xff] }
  0xcc   : > { %v1370_v38 = vadd.f32 %v1338_v48, %v1302_v58  ;;  %v1144_v46 = vsel %vm4528_vm2, %v4055_v7, 0.0  ;;  %v1346_v43 = vmul.f32 %v3070_v50, %v4013_v26  ;;  %v1554_v55 = vmul.f32 %v4025_v25, %v1488_v57  ;;  %v1930_v26 = vpop.f32.mrf.mxu1 }
  0xcd   : > { %v1562_v14 = vadd.f32 %v1530_v56, %v1462_v30  ;;  %v1178_v44 = vmul.f32 %v3990_v12, %v1144_v46  ;;  %v1688_v24 = vsel %vm4369_vm15, %v1656_v5, 0.0  ;;  %v1412_v7 = vsel %vm4528_vm2, %v3071_v27, 0.0  ;;  %v5398_v56 = vld [vmem:[#allocation11_spill] sm:$0xff] }
  0xce   : > { %v1470_v6 = vadd.f32 %v1438_v61, %v1370_v38  ;;  %v1386_v54 = vadd.f32 %v4452_v52, %v1318_v13  ;;  %v4550_v36 = vadd.f32 %v4525_v1, %v2006_v31  ;;  %v1622_v12 = vmul.f32 %v4085_v0, %v1588_v42 }
  0xcf   : > { %v1630_v10 = vadd.f32 %v1598_v29, %v1562_v14  ;;  %v1210_v4 = vadd.f32 %v1178_v44, %v5398_v56  ;;  %v2014_v15 = vmul.f32 %v4497_v53, %v1930_v26  ;;  %v1722_v19 = vmul.f32 %v4104_v32, %v1688_v24 }
  0xd0   : > { %v1570_v41 = vadd.f32 %v1538_v62, %v1470_v6  ;;  %v1486_v51 = vadd.f32 %v4459_v37, %v1386_v54  ;;  %v2842_v3 = vmul.f32 -1.442695, %v4550_v36  ;;  %v1446_v39 = vmul.f32 %v4033_v22, %v1412_v7  ;;  %v3073_v22 = vld [vmem:[%s3156_s10 + $0xda] sm:$0xff]  ;;  %s2876_s10 = sshll.u32 %s5434_s22, 8 }
  0xd1   : > { %v1730_v52 = vadd.f32 %v1698_v2, %v1630_v10  ;;  %v1310_v34 = vadd.f32 %v1278_v8, %v1210_v4  ;;  %v4560_v29 = vadd.f32 %v4525_v1, %v2014_v15  ;;  %v2022_v60 = vmul.f32 %v4497_v53, %v1954_v45  ;;  %v1978_v2 = vpop.f32.mrf.mxu3  ;;  %s4636_s7 = scalar_lea.vmem %s5189_s6, %s2876_s10 }
  0xd2   : > { %v1638_v17 = vadd.f32 %v1606_v28, %v1570_v41  ;;  %v1586_v47 = vadd.f32 %v1554_v55, %v1486_v51  ;;  %2901 = vpow2.f32 %v2842_v3  ;;  %v1546_v48 = vmul.f32 %v3072_v35, %v4025_v25 }
  0xd3   : > { %v1766_v37 = vadd.f32 %v4140_v23, %v1730_v52  ;;  %v1378_v11 = vadd.f32 %v1346_v43, %v1310_v34  ;;  %v2850_v63 = vmul.f32 -1.442695, %v4560_v29  ;;  %v1680_v18 = vsel %vm4528_vm2, %v3073_v22, 0.0 }
  0xd4   : > { %v1738_v62 = vadd.f32 %v1706_v21, %v1638_v17  ;;  %v1654_v33 = vadd.f32 %v1622_v12, %v1586_v47  ;;  %v4571_v16 = vadd.f32 %v4525_v1, %v2022_v60  ;;  %v1614_v58 = vmul.f32 %v3074_v20, %v4085_v0  ;;  %v1909_v0 = vpop.f32.mrf.mxu0  ;;  %v1933_v14 = vpop.f32.mrf.mxu1 }
  0xd5   : > { %2817 = vmatmul.msk.f32.gmra.mxu0 %vm1792_vm4, %v1766_v37  ;;  %v1478_v9 = vadd.f32 %v1446_v39, %v1378_v11  ;;  %2903 = vpow2.f32 %v2850_v63  ;;  %v2030_v25 = vmul.f32 %v4497_v53, %v1978_v2  ;;  %v1714_v5 = vmul.f32 %v4104_v32, %v1680_v18 }
  0xd6   : > { %v1774_v61 = vadd.f32 %v4140_v23, %v1738_v62  ;;  %v1754_v59 = vadd.f32 %v1722_v19, %v1654_v33  ;;  %v2858_v28 = vmul.f32 -1.442695, %v4571_v16  ;;  %v2007_v46 = vmul.f32 %v4497_v53, %v1909_v0 }
  0xd7   : > { %v1578_v57 = vadd.f32 %v1546_v48, %v1478_v9  ;;  %v4581_v31 = vadd.f32 %v4525_v1, %v2030_v25  ;;  %v2015_v24 = vmul.f32 %v4497_v53, %v1933_v14  ;;  %vm2714_vm5 = vcmask 130048  }
  0xd8   : > { %v2902_v30 = vpop.eup %2901  ;;  %2825 = vmatmul.msk.f32.gmra.mxu1 %vm1792_vm4, %v1774_v61  ;;  %v1790_v21 = vadd.f32 %v4140_v23, %v1754_v59  ;;  %2905 = vpow2.f32 %v2858_v28  ;;  %v4591_v50 = vadd.f32 %v4525_v1, %v2007_v46 }
  0xd9   : > { %v1646_v49 = vadd.f32 %v1614_v58, %v1578_v57  ;;  %v2170_v13 = vadd.f32 1.0, %v2902_v30  ;;  %v2866_v38 = vmul.f32 -1.442695, %v4581_v31  ;;  %v4605_v56 = vadd.f32 %v4525_v1, %v2015_v24 }
  0xda   : > { %2841 = vmatmul.msk.f32.gmra.mxu3 %vm1792_vm4, %v1790_v21  ;;  %v2843_v55 = vmul.f32 -1.442695, %v4591_v50 }
  0xdb   : > { %v2904_v40 = vpop.eup %2903  ;;  %v1746_v32 = vadd.f32 %v1714_v5, %v1646_v49  ;;  %2907 = vrcp.f32 %v2170_v13  ;;  %v2211_v27 = vand.u32 2147483647, %v2170_v13  ;;  %v2213_v7 = vand.u32 2147483648, %v2170_v13 }
  0xdc   : > { %v4588_v8 = vadd.f32 1.0, %v2904_v40  ;;  %2909 = vpow2.f32 %v2866_v38  ;;  %v2851_v52 = vmul.f32 -1.442695, %v4605_v56  ;;  %v1957_v34 = vpop.f32.mrf.mxu2 }
  0xdd   : > { %v1782_v43 = vadd.f32 %v4140_v23, %v1746_v32  ;;  %vm4608_vm7 = vcmp.eq.f32.partialorder %v2211_v27, 8.507059e+37  ;;  %v2214_v51 = vor.u32 1.1754944e-38, %v2213_v7  ;;  %v2023_v60 = vmul.f32 %v4497_v53, %v1957_v34 }
  0xde   : > { %v2906_v42 = vpop.eup %2905  ;;  %2911 = vrcp.f32 %v4588_v8  ;;  %v2331_v23 = vand.u32 2147483647, %v4588_v8  ;;  %v2333_v15 = vand.u32 2147483648, %v4588_v8  ;;  %vm2327_vm10 = vweird.f32 %v4588_v8 }
  0xdf   : > { %2833 = vmatmul.msk.f32.gmra.mxu2 %vm1792_vm4, %v1782_v43  ;;  %v4596_v44 = vadd.f32 1.0, %v2906_v42  ;;  %vm2207_vm4 = vweird.f32 %v2170_v13  ;;  %v4631_v2 = vadd.f32 %v4525_v1, %v2023_v60 }
  0xe0   : > { %vm4616_vm11 = vcmp.eq.f32.partialorder %v2331_v23, 8.507059e+37  ;;  %v2334_v35 = vor.u32 1.1754944e-38, %v2333_v15 }
  0xe1   : > { %v2908_v6 = vpop.eup %2907  ;;  %2913 = vrcp.f32 %v4596_v44  ;;  %v2451_v47 = vand.u32 2147483647, %v4596_v44  ;;  %v2453_v63 = vand.u32 2147483648, %v4596_v44  ;;  %vm2447_vm1 = vweird.f32 %v4596_v44 }
  0xe2   : > { %v2910_v54 = vpop.eup %2909  ;;  %v2203_v26 = vmul.f32 %v2908_v6, %v2170_v13  ;;  %2915 = vpow2.f32 %v2843_v55  ;;  %vm2208_vm9 = vweird.f32 %v2908_v6  ;;  %v2859_v0 = vmul.f32 -1.442695, %v4631_v2 }
  0xe3   : > { %v4602_v10 = vadd.f32 1.0, %v2910_v54  ;;  %vm2209_vm12 = vmor %vm2207_vm4, %vm2208_vm9  ;;  %vm4640_vm3 = vcmp.eq.f32.partialorder %v2451_v47, 8.507059e+37  ;;  %v2454_v30 = vor.u32 1.1754944e-38, %v2453_v63 }
  0xe4   : > { %v2912_v4 = vpop.eup %2911  ;;  %v2204_v12 = vsub.f32 1.0, %v2203_v26 }
  0xe5   : > { %v2323_v19 = vmul.f32 %v2912_v4, %v4588_v8  ;;  %2917 = vrcp.f32 %v4602_v10  ;;  %vm2328_vm13 = vweird.f32 %v2912_v4  ;;  %v2571_v21 = vand.u32 2147483647, %v4602_v10 }
  0xe6   : > { %v2205_v3 = vmul.f32 %v2908_v6, %v2204_v12  ;;  %2919 = vpow2.f32 %v2851_v52  ;;  %v1981_v61 = vpop.f32.mrf.mxu3  ;;  %vm2329_vm6 = vmor %vm2327_vm10, %vm2328_vm13  ;;  %v2573_v32 = vand.u32 2147483648, %v4602_v10  ;;  %vm2567_vm0 = vweird.f32 %v4602_v10 }
  0xe7   : > { %v2914_v39 = vpop.eup %2913  ;;  %v2324_v45 = vsub.f32 1.0, %v2323_v19  ;;  %v2031_v38 = vmul.f32 %v4497_v53, %v1981_v61  ;;  %vm2572_vm4 = vcmp.eq.f32.partialorder %v2571_v21, 8.507059e+37 }
  0xe8   : > { %v2916_v37 = vpop.eup %2915  ;;  %v2206_v11 = vadd.f32 %v2908_v6, %v2205_v3  ;;  %v2443_v48 = vmul.f32 %v2914_v39, %v4596_v44  ;;  %vm2448_vm8 = vweird.f32 %v2914_v39  ;;  %v1912_v27 = vpop.f32.mrf.mxu0  ;;  %v2574_v7 = vor.u32 1.1754944e-38, %v2573_v32 }
  0xe9   : > { %v2325_v62 = vmul.f32 %v2912_v4, %v2324_v45  ;;  %v4627_v22 = vadd.f32 1.0, %v2916_v37  ;;  %vm2449_vm15 = vmor %vm2447_vm1, %vm2448_vm8  ;;  %v4664_v14 = vadd.f32 %v4525_v1, %v2031_v38  ;;  %v2008_v23 = vmul.f32 %v4497_v53, %v1912_v27 }
  0xea   : > { %v2210_v18 = vsel %vm2209_vm12, %v2908_v6, %v2206_v11  ;;  %v2444_v33 = vsub.f32 1.0, %v2443_v48 }
  0xeb   : > { %v2918_v9 = vpop.eup %2917  ;;  %v2215_v20 = vsel %vm4608_vm7, %v2214_v51, %v2210_v18  ;;  %v2326_v58 = vadd.f32 %v2912_v4, %v2325_v62  ;;  %2921 = vrcp.f32 %v4627_v22  ;;  %vm2222_vm7 = vweird.f32 %v4627_v22 }
  0xec   : > { %v2682_v59 = vmul.f32 %v2215_v20, %v4550_v36  ;;  %v2445_v28 = vmul.f32 %v2914_v39, %v2444_v33  ;;  %v2563_v57 = vmul.f32 %v2918_v9, %v4602_v10  ;;  %v2920_v46 = vpop.eup %2919  ;;  %vm2568_vm14 = vweird.f32 %v2918_v9 }
  0xed   : > { %v2330_v5 = vsel %vm2329_vm6, %v2912_v4, %v2326_v58  ;;  %2923 = vpow2.f32 %v2859_v0  ;;  %v4661_v42 = vadd.f32 1.0, %v2920_v46  ;;  %vm2569_vm2 = vmor %vm2567_vm0, %vm2568_vm14  ;;  %v2226_v12 = vand.u32 2147483647, %v4627_v22 }
  0xee   : > { %2715 = vst.msk [vmem:[%s4636_s7] sm:$0xff] %vm2714_vm5, %v2682_v59  ;;  %v2335_v36 = vsel %vm4616_vm11, %v2334_v35, %v2330_v5  ;;  %v2446_v49 = vadd.f32 %v2914_v39, %v2445_v28  ;;  %v2564_v13 = vsub.f32 1.0, %v2563_v57  ;;  %v2228_v15 = vand.u32 2147483648, %v4627_v22 }
  0xef   : > { %v2690_v40 = vmul.f32 %v2335_v36, %v4560_v29  ;;  %2925 = vrcp.f32 %v4661_v42  ;;  %v4684_v3 = vadd.f32 %v4525_v1, %v2008_v23  ;;  %vm2227_vm11 = vcmp.eq.f32.partialorder %v2226_v12, 8.507059e+37 }
  0xf0   : > { %v2450_v8 = vsel %vm2449_vm15, %v2914_v39, %v2446_v49  ;;  %v2565_v43 = vmul.f32 %v2918_v9, %v2564_v13  ;;  %v1936_v52 = vpop.f32.mrf.mxu1  ;;  %v2229_v45 = vor.u32 1.1754944e-38, %v2228_v15  ;;  %v2346_v62 = vand.u32 2147483647, %v4661_v42 }
  0xf1   : > { %v2922_v55 = vpop.eup %2921  ;;  %2723 = vst.msk [vmem:[%s4636_s7 + $0x40] sm:$0xff] %vm2714_vm5, %v2690_v40  ;;  %v2455_v29 = vsel %vm4640_vm3, %v2454_v30, %v2450_v8  ;;  %v2844_v17 = vmul.f32 -1.442695, %v4684_v3  ;;  %vm2342_vm12 = vweird.f32 %v4661_v42 }
  0xf2   : > { %v2698_v44 = vmul.f32 %v2455_v29, %v4571_v16  ;;  %v2566_v24 = vadd.f32 %v2918_v9, %v2565_v43  ;;  %v2218_v6 = vmul.f32 %v2922_v55, %v4627_v22  ;;  %v2867_v16 = vmul.f32 -1.442695, %v4664_v14 }
  0xf3   : > { %v2924_v10 = vpop.eup %2923  ;;  %vm2223_vm9 = vweird.f32 %v2922_v55  ;;  %v2348_v22 = vand.u32 2147483648, %v4661_v42  ;;  %vm2347_vm3 = vcmp.eq.f32.partialorder %v2346_v62, 8.507059e+37 }
  0xf4   : > { %2731 = vst.msk [vmem:[%s4636_s7 + $0x80] sm:$0xff] %vm2714_vm5, %v2698_v44  ;;  %v2570_v54 = vsel %vm2569_vm2, %v2918_v9, %v2566_v24  ;;  %v2219_v26 = vsub.f32 1.0, %v2218_v6  ;;  %v2187_v19 = vadd.f32 1.0, %v2924_v10  ;;  %2927 = vpow2.f32 %v2867_v16  ;;  %vm2224_vm10 = vmor %vm2222_vm7, %vm2223_vm9 }
  0xf5   : > { %v2575_v4 = vsel %vm2572_vm4, %v2574_v7, %v2570_v54  ;;  %v2926_v39 = vpop.eup %2925  ;;  %v2349_v59 = vor.u32 1.1754944e-38, %v2348_v22 }
  0xf6   : > { %v2706_v41 = vmul.f32 %v2575_v4, %v4581_v31  ;;  %v2220_v51 = vmul.f32 %v2922_v55, %v2219_v26  ;;  %2929 = vrcp.f32 %v2187_v19  ;;  %v2016_v31 = vmul.f32 %v4497_v53, %v1936_v52 }
  0xf7   : > { %v2338_v60 = vmul.f32 %v2926_v39, %v4661_v42  ;;  %2931 = vpow2.f32 %v2844_v17  ;;  %vm2343_vm13 = vweird.f32 %v2926_v39  ;;  %v2466_v30 = vand.u32 2147483647, %v2187_v19 }
  0xf8   : > { %2739 = vst.msk [vmem:[%s4636_s7 + $0xc0] sm:$0xff] %vm2714_vm5, %v2706_v41  ;;  %v2221_v34 = vadd.f32 %v2922_v55, %v2220_v51  ;;  %v4694_v11 = vadd.f32 %v4525_v1, %v2016_v31  ;;  %vm2344_vm1 = vmor %vm2342_vm12, %vm2343_vm13  ;;  %v2468_v21 = vand.u32 2147483648, %v2187_v19  ;;  %vm2462_vm8 = vweird.f32 %v2187_v19 }
  0xf9   : > { %v2339_v63 = vsub.f32 1.0, %v2338_v60  ;;  %vm2467_vm14 = vcmp.eq.f32.partialorder %v2466_v30, 8.507059e+37 }
  0xfa   : > { %v2225_v47 = vsel %vm2224_vm10, %v2922_v55, %v2221_v34  ;;  %v2928_v35 = vpop.eup %2927  ;;  %v2852_v33 = vmul.f32 -1.442695, %v4694_v11  ;;  %v2469_v43 = vor.u32 1.1754944e-38, %v2468_v21 }
  0xfb   : > { %v2230_v37 = vsel %vm2227_vm11, %v2229_v45, %v2225_v47  ;;  %v4699_v18 = vadd.f32 1.0, %v2928_v35  ;;  %v2340_v20 = vmul.f32 %v2926_v39, %v2339_v63 }
  0xfc   : > { %v2683_v48 = vmul.f32 %v2230_v37, %v4591_v50  ;;  %v2930_v9 = vpop.eup %2929 }
  0xfd   : > { %v1960_v58 = vpop.f32.mrf.mxu2  ;;  %v2458_v25 = vmul.f32 %v2930_v9, %v2187_v19  ;;  %2933 = vrcp.f32 %v4699_v18  ;;  %v2341_v50 = vadd.f32 %v2926_v39, %v2340_v20  ;;  %v2932_v61 = vpop.eup %2931  ;;  %vm2463_vm6 = vweird.f32 %v2930_v9 }
  0xfe   : > { %2716 = vst.msk [vmem:[%s4636_s7 + $0x8] sm:$0xff] %vm2714_vm5, %v2683_v48  ;;  %2935 = vpow2.f32 %v2852_v33  ;;  %v2024_v57 = vmul.f32 %v4497_v53, %v1960_v58  ;;  %v4707_v0 = vadd.f32 1.0, %v2932_v61  ;;  %vm2464_vm15 = vmor %vm2462_vm8, %vm2463_vm6  ;;  %v2586_v29 = vand.u32 2147483647, %v4699_v18 }
  0xff   : > { %v2459_v28 = vsub.f32 1.0, %v2458_v25  ;;  %v2345_v5 = vsel %vm2344_vm1, %v2926_v39, %v2341_v50  ;;  %v2588_v27 = vand.u32 2147483648, %v4699_v18  ;;  %vm2582_vm2 = vweird.f32 %v4699_v18 }
 0x100   : > { %v2350_v36 = vsel %vm2347_vm3, %v2349_v59, %v2345_v5  ;;  %v4710_v13 = vadd.f32 %v4525_v1, %v2024_v57  ;;  %2937 = vrcp.f32 %v4707_v0  ;;  %vm4731_vm4 = vcmp.eq.f32.partialorder %v2586_v29, 8.507059e+37 }
 0x101   : > { %v2460_v49 = vmul.f32 %v2930_v9, %v2459_v28  ;;  %v2691_v38 = vmul.f32 %v2350_v36, %v4605_v56  ;;  %v2589_v41 = vor.u32 1.1754944e-38, %v2588_v27  ;;  %vm2237_vm7 = vweird.f32 %v4707_v0 }
 0x102   : > { %v2860_v32 = vmul.f32 -1.442695, %v4710_v13  ;;  %v2241_v34 = vand.u32 2147483647, %v4707_v0  ;;  %v2243_v39 = vand.u32 2147483648, %v4707_v0 }
 0x103   : > { %v2934_v46 = vpop.eup %2933  ;;  %v2461_v40 = vadd.f32 %v2930_v9, %v2460_v49  ;;  %2724 = vst.msk [vmem:[%s4636_s7 + $0x48] sm:$0xff] %vm2714_vm5, %v2691_v38 }
 0x104   : > { %v2936_v8 = vpop.eup %2935  ;;  %v2578_v42 = vmul.f32 %v2934_v46, %v4699_v18  ;;  %2939 = vpow2.f32 %v2860_v32  ;;  %vm2583_vm0 = vweird.f32 %v2934_v46  ;;  %vm2242_vm11 = vcmp.eq.f32.partialorder %v2241_v34, 8.507059e+37 }
 0x105   : > { %v2465_v55 = vsel %vm2464_vm15, %v2930_v9, %v2461_v40  ;;  %v4719_v56 = vadd.f32 1.0, %v2936_v8  ;;  %v1915_v10 = vpop.f32.mrf.mxu0  ;;  %vm2584_vm9 = vmor %vm2582_vm2, %vm2583_vm0  ;;  %v2244_v33 = vor.u32 1.1754944e-38, %v2243_v39 }
 0x106   : > { %v1984_v44 = vpop.f32.mrf.mxu3  ;;  %v2470_v24 = vsel %vm2467_vm14, %v2469_v43, %v2465_v55  ;;  %v2579_v6 = vsub.f32 1.0, %v2578_v42  ;;  %v2938_v26 = vpop.eup %2937 }
 0x107   : > { %v2032_v7 = vmul.f32 %v4497_v53, %v1984_v44  ;;  %v2699_v54 = vmul.f32 %v2470_v24, %v4631_v2  ;;  %2941 = vrcp.f32 %v4719_v56  ;;  %v2233_v12 = vmul.f32 %v2938_v26, %v4707_v0 }
 0x108   : > { %v2580_v16 = vmul.f32 %v2934_v46, %v2579_v6  ;;  %v2009_v2 = vmul.f32 %v4497_v53, %v1915_v10  ;;  %vm2238_vm10 = vweird.f32 %v2938_v26  ;;  %vm2357_vm13 = vweird.f32 %v4719_v56 }
 0x109   : > { %v4726_v23 = vadd.f32 %v4525_v1, %v2032_v7  ;;  %2732 = vst.msk [vmem:[%s4636_s7 + $0x88] sm:$0xff] %vm2714_vm5, %v2699_v54  ;;  %v2234_v52 = vsub.f32 1.0, %v2233_v12  ;;  %vm2239_vm12 = vmor %vm2237_vm7, %vm2238_vm10  ;;  %v2361_v58 = vand.u32 2147483647, %v4719_v56  ;;  %v2363_v25 = vand.u32 2147483648, %v4719_v56 }
 0x10a   : > { %v2581_v15 = vadd.f32 %v2934_v46, %v2580_v16  ;;  %v2940_v19 = vpop.eup %2939  ;;  %v4742_v45 = vadd.f32 %v4525_v1, %v2009_v2 }
 0x10b   : > { %v2868_v51 = vmul.f32 -1.442695, %v4726_v23  ;;  %v4744_v31 = vadd.f32 1.0, %v2940_v19  ;;  %v2235_v35 = vmul.f32 %v2938_v26, %v2234_v52  ;;  %v2364_v0 = vor.u32 1.1754944e-38, %v2363_v25 }
 0x10c   : > { %v2585_v17 = vsel %vm2584_vm9, %v2934_v46, %v2581_v15  ;;  %v2845_v48 = vmul.f32 -1.442695, %v4742_v45  ;;  %vm2362_vm6 = vcmp.eq.f32.partialorder %v2361_v58, 8.507059e+37 }
 0x10d   : > { %2943 = vpow2.f32 %v2868_v51  ;;  %v1939_v47 = vpop.f32.mrf.mxu1  ;;  %v2942_v60 = vpop.eup %2941  ;;  %v2590_v37 = vsel %vm4731_vm4, %v2589_v41, %v2585_v17  ;;  %v2236_v18 = vadd.f32 %v2938_v26, %v2235_v35  ;;  %v2483_v8 = vand.u32 2147483648, %v4744_v31 }
 0x10e   : > { %v2017_v63 = vmul.f32 %v4497_v53, %v1939_v47  ;;  %v2707_v62 = vmul.f32 %v2590_v37, %v4664_v14  ;;  %v2353_v22 = vmul.f32 %v2942_v60, %v4719_v56  ;;  %2945 = vrcp.f32 %v4744_v31 }
 0x10f   : > { %2947 = vpow2.f32 %v2845_v48  ;;  %v2240_v14 = vsel %vm2239_vm12, %v2938_v26, %v2236_v18  ;;  %vm2358_vm1 = vweird.f32 %v2942_v60  ;;  %v2481_v55 = vand.u32 2147483647, %v4744_v31 }
 0x110   : > { %2740 = vst.msk [vmem:[%s4636_s7 + $0xc8] sm:$0xff] %vm2714_vm5, %v2707_v62  ;;  %v2354_v9 = vsub.f32 1.0, %v2353_v22  ;;  %v4759_v20 = vadd.f32 %v4525_v1, %v2017_v63  ;;  %v2245_v61 = vsel %vm2242_vm11, %v2244_v33, %v2240_v14  ;;  %vm2359_vm3 = vmor %vm2357_vm13, %vm2358_vm1  ;;  %vm2477_vm15 = vweird.f32 %v4744_v31 }
 0x111   : > { %v2684_v57 = vmul.f32 %v2245_v61, %v4684_v3  ;;  %v2484_v27 = vor.u32 1.1754944e-38, %v2483_v8  ;;  %vm2482_vm0 = vcmp.eq.f32.partialorder %v2481_v55, 8.507059e+37 }
 0x112   : > { %v2355_v59 = vmul.f32 %v2942_v60, %v2354_v9  ;;  %v2853_v28 = vmul.f32 -1.442695, %v4759_v20 }
 0x113   : > { %v2944_v50 = vpop.eup %2943  ;;  %2717 = vst.msk [vmem:[%s4636_s7 + $0x10] sm:$0xff] %vm2714_vm5, %v2684_v57 }
 0x114   : > { %v4766_v5 = vadd.f32 1.0, %v2944_v50  ;;  %v2946_v30 = vpop.eup %2945  ;;  %v2356_v21 = vadd.f32 %v2942_v60, %v2355_v59  ;;  %2949 = vpow2.f32 %v2853_v28 }
 0x115   : > { %v2473_v36 = vmul.f32 %v2946_v30, %v4744_v31  ;;  %v2948_v49 = vpop.eup %2947  ;;  %vm2478_vm8 = vweird.f32 %v2946_v30 }
 0x116   : > { %2951 = vrcp.f32 %v4766_v5  ;;  %v2360_v38 = vsel %vm2359_vm3, %v2942_v60, %v2356_v21  ;;  %v4772_v3 = vadd.f32 1.0, %v2948_v49  ;;  %vm2479_vm14 = vmor %vm2477_vm15, %vm2478_vm8  ;;  %v2603_v54 = vand.u32 2147483648, %v4766_v5 }
 0x117   : > { %v2365_v46 = vsel %vm2362_vm6, %v2364_v0, %v2360_v38  ;;  %v2474_v40 = vsub.f32 1.0, %v2473_v36  ;;  %vm2597_vm2 = vweird.f32 %v4766_v5  ;;  %v1918_v47 = vpop.f32.mrf.mxu0 }
 0x118   : > { %v2692_v32 = vmul.f32 %v2365_v46, %v4694_v11  ;;  %2953 = vrcp.f32 %v4772_v3  ;;  %v2601_v11 = vand.u32 2147483647, %v4766_v5  ;;  %v2256_v10 = vand.u32 2147483647, %v4772_v3 }
 0x119   : > { %v1963_v43 = vpop.f32.mrf.mxu2  ;;  %v2475_v42 = vmul.f32 %v2946_v30, %v2474_v40  ;;  %v2258_v2 = vand.u32 2147483648, %v4772_v3  ;;  %v2604_v39 = vor.u32 1.1754944e-38, %v2603_v54  ;;  %vm2252_vm9 = vweird.f32 %v4772_v3 }
 0x11a   : > { %v2950_v29 = vpop.eup %2949  ;;  %2725 = vst.msk [vmem:[%s4636_s7 + $0x50] sm:$0xff] %vm2714_vm5, %v2692_v32  ;;  %v2025_v56 = vmul.f32 %v4497_v53, %v1963_v43  ;;  %vm4796_vm4 = vcmp.eq.f32.partialorder %v2601_v11, 8.507059e+37  ;;  %vm4804_vm10 = vcmp.eq.f32.partialorder %v2256_v10, 8.507059e+37  ;;  %v2010_v48 = vmul.f32 %v4497_v53, %v1918_v47 }
 0x11b   : > { %v2476_v24 = vadd.f32 %v2946_v30, %v2475_v42  ;;  %v4783_v6 = vadd.f32 1.0, %v2950_v29  ;;  %v2259_v35 = vor.u32 1.1754944e-38, %v2258_v2 }
 0x11c   : > { %v2952_v44 = vpop.eup %2951  ;;  %v4788_v26 = vadd.f32 %v4525_v1, %v2025_v56  ;;  %v1942_v63 = vpop.f32.mrf.mxu1  ;;  %v4824_v61 = vadd.f32 %v4525_v1, %v2010_v48 }
 0x11d   : > { %v2593_v7 = vmul.f32 %v2952_v44, %v4766_v5  ;;  %v2480_v16 = vsel %vm2479_vm14, %v2946_v30, %v2476_v24  ;;  %2955 = vrcp.f32 %v4783_v6  ;;  %vm2598_vm7 = vweird.f32 %v2952_v44 }
 0x11e   : > { %v2485_v4 = vsel %vm2482_vm0, %v2484_v27, %v2480_v16  ;;  %v2861_v15 = vmul.f32 -1.442695, %v4788_v26  ;;  %v2954_v41 = vpop.eup %2953  ;;  %vm2599_vm11 = vmor %vm2597_vm2, %vm2598_vm7  ;;  %vm2372_vm12 = vweird.f32 %v4783_v6  ;;  %v2376_v22 = vand.u32 2147483647, %v4783_v6 }
 0x11f   : > { %v2594_v12 = vsub.f32 1.0, %v2593_v7  ;;  %v2700_v51 = vmul.f32 %v2485_v4, %v4710_v13  ;;  %v2248_v17 = vmul.f32 %v2954_v41, %v4772_v3  ;;  %v2018_v33 = vmul.f32 %v4497_v53, %v1942_v63 }
 0x120   : > { %2957 = vpow2.f32 %v2861_v15  ;;  %vm2253_vm13 = vweird.f32 %v2954_v41  ;;  %v2378_v30 = vand.u32 2147483648, %v4783_v6  ;;  %v2846_v0 = vmul.f32 -1.442695, %v4824_v61 }
 0x121   : > { %v1987_v52 = vpop.f32.mrf.mxu3  ;;  %v2595_v34 = vmul.f32 %v2952_v44, %v2594_v12  ;;  %2733 = vst.msk [vmem:[%s4636_s7 + $0x90] sm:$0xff] %vm2714_vm5, %v2700_v51  ;;  %v2249_v37 = vsub.f32 1.0, %v2248_v17  ;;  %v4827_v59 = vadd.f32 %v4525_v1, %v2018_v33  ;;  %vm2254_vm1 = vmor %vm2252_vm9, %vm2253_vm13  ;;  %vm2377_vm8 = vcmp.eq.f32.partialorder %v2376_v22, 8.507059e+37 }
 0x122   : > { %v2033_v13 = vmul.f32 %v4497_v53, %v1987_v52  ;;  %v2379_v55 = vor.u32 1.1754944e-38, %v2378_v30 }
 0x123   : > { %v2596_v60 = vadd.f32 %v2952_v44, %v2595_v34  ;;  %v2956_v62 = vpop.eup %2955  ;;  %v2250_v14 = vmul.f32 %v2954_v41, %v2249_v37  ;;  %v2854_v36 = vmul.f32 -1.442695, %v4827_v59 }
 0x124   : > { %v4816_v18 = vadd.f32 %v4525_v1, %v2033_v13  ;;  %v2368_v58 = vmul.f32 %v2956_v62, %v4783_v6  ;;  %vm2373_vm3 = vweird.f32 %v2956_v62  ;;  %v1966_v49 = vpop.f32.mrf.mxu2 }
 0x125   : > { %v2600_v9 = vsel %vm2599_vm11, %v2952_v44, %v2596_v60  ;;  %v2251_v57 = vadd.f32 %v2954_v41, %v2250_v14  ;;  %v2026_v40 = vmul.f32 %v4497_v53, %v1966_v49  ;;  %vm2374_vm6 = vmor %vm2372_vm12, %vm2373_vm3 }
 0x126   : > { %v2605_v25 = vsel %vm4796_vm4, %v2604_v39, %v2600_v9  ;;  %v2869_v50 = vmul.f32 -1.442695, %v4816_v18  ;;  %v2369_v5 = vsub.f32 1.0, %v2368_v58  ;;  %v2958_v21 = vpop.eup %2957 }
 0x127   : > { %v2708_v28 = vmul.f32 %v2605_v25, %v4726_v23  ;;  %v2255_v38 = vsel %vm2254_vm1, %v2954_v41, %v2251_v57  ;;  %v4837_v46 = vadd.f32 1.0, %v2958_v21  ;;  %v4849_v29 = vadd.f32 %v4525_v1, %v2026_v40 }
 0x128   : > { %2959 = vpow2.f32 %v2869_v50  ;;  %v2370_v23 = vmul.f32 %v2956_v62, %v2369_v5  ;;  %v2260_v3 = vsel %vm4804_vm10, %v2259_v35, %v2255_v38 }
 0x129   : > { %2741 = vst.msk [vmem:[%s4636_s7 + $0xd0] sm:$0xff] %vm2714_vm5, %v2708_v28  ;;  %v1990_v32 = vpop.f32.mrf.mxu3  ;;  %2961 = vpow2.f32 %v2846_v0  ;;  %v2685_v43 = vmul.f32 %v2260_v3, %v4742_v45  ;;  %v2862_v11 = vmul.f32 -1.442695, %v4849_v29  ;;  %v2496_v12 = vand.u32 2147483647, %v4837_v46 }
 0x12a   : > { %v2034_v8 = vmul.f32 %v4497_v53, %v1990_v32  ;;  %v2371_v42 = vadd.f32 %v2956_v62, %v2370_v23  ;;  %2963 = vrcp.f32 %v4837_v46  ;;  %vm2492_vm15 = vweird.f32 %v4837_v46 }
 0x12b   : > { %2965 = vpow2.f32 %v2854_v36  ;;  %2718 = vst.msk [vmem:[%s4636_s7 + $0x18] sm:$0xff] %vm2714_vm5, %v2685_v43  ;;  %vm4879_vm14 = vcmp.eq.f32.partialorder %v2496_v12, 8.507059e+37 }
 0x12c   : > { %v2375_v56 = vsel %vm2374_vm6, %v2956_v62, %v2371_v42  ;;  %v4854_v44 = vadd.f32 %v4525_v1, %v2034_v8  ;;  %2967 = vpow2.f32 %v2862_v11 }
 0x12d   : > { %v2380_v24 = vsel %vm2377_vm8, %v2379_v55, %v2375_v56 }
 0x12e   : > { %v2960_v45 = vpop.eup %2959  ;;  %v2693_v6 = vmul.f32 %v2380_v24, %v4759_v20  ;;  %v2870_v54 = vmul.f32 -1.442695, %v4854_v44  ;;  %v2498_v20 = vand.u32 2147483648, %v4837_v46 }
 0x12f   : > { %v1921_v27 = vpop.f32.mrf.mxu0  ;;  %v4858_v7 = vadd.f32 1.0, %v2960_v45  ;;  %v2962_v10 = vpop.eup %2961 }
 0x130   : > { %v2011_v16 = vmul.f32 %v4497_v53, %v1921_v27  ;;  %v2964_v4 = vpop.eup %2963  ;;  %2726 = vst.msk [vmem:[%s4636_s7 + $0x58] sm:$0xff] %vm2714_vm5, %v2693_v6  ;;  %v4868_v41 = vadd.f32 1.0, %v2962_v10  ;;  %v2499_v60 = vor.u32 1.1754944e-38, %v2498_v20  ;;  %v4934_v6 = vld [vmem:[%s5187_s4] ss:$0 sm:$0xff] }
 0x131   : > { %2969 = vrcp.f32 %v4858_v7  ;;  %v2966_v2 = vpop.eup %2965  ;;  %v2488_v15 = vmul.f32 %v2964_v4, %v4837_v46  ;;  %v2618_v51 = vand.u32 2147483648, %v4858_v7  ;;  %v2616_v39 = vand.u32 2147483647, %v4858_v7 }
 0x132   : > { %2971 = vpow2.f32 %v2870_v54  ;;  %v4871_v19 = vadd.f32 1.0, %v2966_v2  ;;  %v4874_v52 = vadd.f32 %v4525_v1, %v2011_v16  ;;  %v2273_v31 = vand.u32 2147483648, %v4868_v41  ;;  %v2968_v13 = vpop.eup %2967  ;;  %v1945_v58 = vpop.f32.mrf.mxu1 }
 0x133   : > { %v2489_v34 = vsub.f32 1.0, %v2488_v15  ;;  %2973 = vrcp.f32 %v4868_v41  ;;  %vm2493_vm0 = vweird.f32 %v2964_v4  ;;  %vm2612_vm2 = vweird.f32 %v4858_v7 }
 0x134   : > { %2975 = vrcp.f32 %v4871_v19  ;;  %v2847_v37 = vmul.f32 -1.442695, %v4874_v52  ;;  %v2619_v48 = vor.u32 1.1754944e-38, %v2618_v51  ;;  %v2271_v63 = vand.u32 2147483647, %v4868_v41  ;;  %vm2494_vm10 = vmor %vm2492_vm15, %vm2493_vm0 }
 0x135   : > { %v2490_v47 = vmul.f32 %v2964_v4, %v2489_v34  ;;  %v4888_v62 = vadd.f32 1.0, %v2968_v13  ;;  %vm4891_vm4 = vcmp.eq.f32.partialorder %v2616_v39, 8.507059e+37  ;;  %vm2267_vm7 = vweird.f32 %v4868_v41 }
 0x136   : > { %vm2387_vm9 = vweird.f32 %v4871_v19  ;;  %v2274_v25 = vor.u32 1.1754944e-38, %v2273_v31  ;;  %v2391_v50 = vand.u32 2147483647, %v4871_v19  ;;  %v2393_v28 = vand.u32 2147483648, %v4871_v19 }
 0x137   : > { %v2970_v35 = vpop.eup %2969  ;;  %v2491_v33 = vadd.f32 %v2964_v4, %v2490_v47  ;;  %2977 = vrcp.f32 %v4888_v62  ;;  %vm4908_vm12 = vcmp.eq.f32.partialorder %v2271_v63, 8.507059e+37  ;;  %v2019_v23 = vmul.f32 %v4497_v53, %v1945_v58 }
 0x138   : > { %v2972_v22 = vpop.eup %2971  ;;  %v2608_v9 = vmul.f32 %v2970_v35, %v4858_v7  ;;  %2979 = vpow2.f32 %v2847_v37  ;;  %vm2613_vm11 = vweird.f32 %v2970_v35  ;;  %v2511_v3 = vand.u32 2147483647, %v4888_v62 }
 0x139   : > { %v2974_v57 = vpop.eup %2973  ;;  %v2495_v5 = vsel %vm2494_vm10, %v2964_v4, %v2491_v33  ;;  %v4903_v21 = vadd.f32 1.0, %v2972_v22  ;;  %vm4916_vm13 = vcmp.eq.f32.partialorder %v2391_v50, 8.507059e+37  ;;  %v2394_v55 = vor.u32 1.1754944e-38, %v2393_v28  ;;  %vm2614_vm3 = vmor %vm2612_vm2, %vm2613_vm11 }
 0x13a   : > { %v2609_v30 = vsub.f32 1.0, %v2608_v9  ;;  %v2976_v0 = vpop.eup %2975  ;;  %v2500_v36 = vsel %vm4879_vm14, %v2499_v60, %v2495_v5  ;;  %v2263_v49 = vmul.f32 %v2974_v57, %v4868_v41  ;;  %v1969_v8 = vpop.f32.mrf.mxu2  ;;  %vm2507_vm1 = vweird.f32 %v4888_v62 }
 0x13b   : > { %v2701_v46 = vmul.f32 %v2500_v36, %v4788_v26  ;;  %v2383_v32 = vmul.f32 %v2976_v0, %v4871_v19  ;;  %2981 = vrcp.f32 %v4903_v21  ;;  %v2513_v26 = vand.u32 2147483648, %v4888_v62  ;;  %v1924_v45 = vpop.f32.mrf.mxu0 }
 0x13c   : > { %v2610_v40 = vmul.f32 %v2970_v35, %v2609_v30  ;;  %v2264_v43 = vsub.f32 1.0, %v2263_v49  ;;  %vm2268_vm6 = vweird.f32 %v2974_v57  ;;  %v4929_v27 = vadd.f32 %v4525_v1, %v2019_v23 }
 0x13d   : > { %2734 = vst.msk [vmem:[%s4636_s7 + $0x98] sm:$0xff] %vm2714_vm5, %v2701_v46  ;;  %v2384_v53 = vsub.f32 1.0, %v2383_v32  ;;  %v2978_v24 = vpop.eup %2977  ;;  %v2027_v54 = vmul.f32 %v4934_v6, %v1969_v8  ;;  %vm2388_vm8 = vweird.f32 %v2976_v0  ;;  %vm4938_vm15 = vcmp.eq.f32.partialorder %v2511_v3, 8.507059e+37  ;;  %vm2269_vm0 = vmor %vm2267_vm7, %vm2268_vm6 }
 0x13e   : > { %v2611_v56 = vadd.f32 %v2970_v35, %v2610_v40  ;;  %v2265_v11 = vmul.f32 %v2974_v57, %v2264_v43  ;;  %v2980_v16 = vpop.eup %2979  ;;  %v2503_v12 = vmul.f32 %v2978_v24, %v4888_v62  ;;  %vm2508_vm14 = vweird.f32 %v2978_v24  ;;  %vm2389_vm2 = vmor %vm2387_vm9, %vm2388_vm8 }
 0x13f   : > { %v2385_v4 = vmul.f32 %v2976_v0, %v2384_v53  ;;  %v2012_v20 = vmul.f32 %v4934_v6, %v1924_v45  ;;  %v4949_v17 = vadd.f32 1.0, %v2980_v16  ;;  %v2855_v47 = vmul.f32 -1.442695, %v4929_v27 }
 0x140   : > { %v2615_v10 = vsel %vm2614_vm3, %v2970_v35, %v2611_v56  ;;  %v2266_v15 = vadd.f32 %v2974_v57, %v2265_v11  ;;  %v2504_v39 = vsub.f32 1.0, %v2503_v12  ;;  %v2631_v33 = vand.u32 2147483647, %v4903_v21 }
 0x141   : > { %v1993_v2 = vpop.f32.mrf.mxu3  ;;  %v2620_v1 = vsel %vm4891_vm4, %v2619_v48, %v2615_v10  ;;  %v2386_v34 = vadd.f32 %v2976_v0, %v2385_v4  ;;  %v2982_v31 = vpop.eup %2981  ;;  %2983 = vrcp.f32 %v4949_v17  ;;  %v2514_v58 = vor.u32 1.1754944e-38, %v2513_v26  ;;  %vm2509_vm4 = vmor %vm2507_vm1, %vm2508_vm14 }
 0x142   : > { %v2709_v51 = vmul.f32 %v2620_v1, %v4816_v18  ;;  %v2270_v13 = vsel %vm2269_vm0, %v2974_v57, %v2266_v15  ;;  %v4958_v18 = vld [vmem:[%s5188_s5] ss:$0 sm:$0xff]  ;;  %v2035_v60 = vmul.f32 %v4934_v6, %v1993_v2  ;;  %v2505_v35 = vmul.f32 %v2978_v24, %v2504_v39  ;;  %v1948_v30 = vpop.f32.mrf.mxu1 }
 0x143   : > { %v4961_v41 = vadd.f32 %v4958_v18, %v2027_v54  ;;  %v2275_v37 = vsel %vm4908_vm12, %v2274_v25, %v2270_v13  ;;  %v2390_v19 = vsel %vm2389_vm2, %v2976_v0, %v2386_v34  ;;  %v2623_v48 = vmul.f32 %v2982_v31, %v4903_v21 }
 0x144   : > { %2742 = vst.msk [vmem:[%s4636_s7 + $0xd8] sm:$0xff] %vm2714_vm5, %v2709_v51  ;;  %v2686_v63 = vmul.f32 %v2275_v37, %v4824_v61  ;;  %v2395_v22 = vsel %vm4916_vm13, %v2394_v55, %v2390_v19  ;;  %v2506_v14 = vadd.f32 %v2978_v24, %v2505_v35  ;;  %vm2628_vm7 = vweird.f32 %v2982_v31 }
 0x145   : > { %v2694_v9 = vmul.f32 %v2395_v22, %v4827_v59  ;;  %v2624_v50 = vsub.f32 1.0, %v2623_v48  ;;  %v2633_v61 = vand.u32 2147483648, %v4903_v21  ;;  %2985 = vpow2.f32 %v2855_v47 }
 0x146   : > { %2719 = vst.msk [vmem:[%s4636_s7 + $0x20] sm:$0xff] %vm2714_vm5, %v2686_v63  ;;  %v2863_v25 = vmul.f32 -1.442695, %v4961_v41  ;;  %v2510_v28 = vsel %vm2509_vm4, %v2978_v24, %v2506_v14  ;;  %v4985_v59 = vadd.f32 %v4958_v18, %v2035_v60  ;;  %v4988_v5 = vadd.f32 %v4958_v18, %v2012_v20 }
 0x147   : > { %2727 = vst.msk [vmem:[%s4636_s7 + $0x60] sm:$0xff] %vm2714_vm5, %v2694_v9  ;;  %v2625_v57 = vmul.f32 %v2982_v31, %v2624_v50  ;;  %v2515_v62 = vsel %vm4938_vm15, %v2514_v58, %v2510_v28  ;;  %vm2627_vm9 = vweird.f32 %v4903_v21  ;;  %vm4993_vm10 = vcmp.eq.f32.partialorder %v2631_v33, 8.507059e+37  ;;  %v2984_v32 = vpop.eup %2983 }
 0x148   : > { %2987 = vpow2.f32 %v2863_v25  ;;  %v2702_v49 = vmul.f32 %v2515_v62, %v4849_v29  ;;  %v2871_v23 = vmul.f32 -1.442695, %v4985_v59  ;;  %v2848_v46 = vmul.f32 -1.442695, %v4988_v5  ;;  %vm2629_vm11 = vmor %vm2627_vm9, %vm2628_vm7 }
 0x149   : > { %v2626_v38 = vadd.f32 %v2982_v31, %v2625_v57  ;;  %v2634_v3 = vor.u32 1.1754944e-38, %v2633_v61  ;;  %v2020_v21 = vmul.f32 %v4934_v6, %v1948_v30  ;;  %v2278_v29 = vmul.f32 %v2984_v32, %v4949_v17 }
 0x14a   : > { %v1996_v36 = vpop.f32.mrf.mxu3  ;;  %2735 = vst.msk [vmem:[%s4636_s7 + $0xa0] sm:$0xff] %vm2714_vm5, %v2702_v49  ;;  %v2286_v55 = vand.u32 2147483647, %v4949_v17  ;;  %2989 = vpow2.f32 %v2871_v23  ;;  %v2288_v4 = vand.u32 2147483648, %v4949_v17  ;;  %vm2282_vm12 = vweird.f32 %v4949_v17 }
 0x14b   : > { %v1972_v40 = vpop.f32.mrf.mxu2  ;;  %v2036_v43 = vmul.f32 %v4934_v6, %v1996_v36  ;;  %v2630_v42 = vsel %vm2629_vm11, %v2982_v31, %v2626_v38  ;;  %v2986_v56 = vpop.eup %2985  ;;  %2991 = vpow2.f32 %v2848_v46  ;;  %v5011_v26 = vadd.f32 %v4958_v18, %v2020_v21 }
 0x14c   : > { %v2028_v8 = vmul.f32 %v4934_v6, %v1972_v40  ;;  %v2635_v53 = vsel %vm4993_vm10, %v2634_v3, %v2630_v42  ;;  %v2279_v11 = vsub.f32 1.0, %v2278_v29  ;;  %v5017_v54 = vadd.f32 1.0, %v2986_v56 }
 0x14d   : > { %v2710_v24 = vmul.f32 %v2635_v53, %v4854_v44  ;;  %v5020_v16 = vadd.f32 %v4958_v18, %v2036_v43  ;;  %v2856_v12 = vmul.f32 -1.442695, %v5011_v26  ;;  %vm2283_vm13 = vweird.f32 %v2984_v32 }
 0x14e   : > { %v5014_v45 = vadd.f32 %v4958_v18, %v2028_v8  ;;  %v2988_v10 = vpop.eup %2987  ;;  %v2280_v2 = vmul.f32 %v2984_v32, %v2279_v11  ;;  %2993 = vrcp.f32 %v5017_v54  ;;  %vm2284_vm1 = vmor %vm2282_vm12, %vm2283_vm13  ;;  %vm2287_vm3 = vcmp.eq.f32.partialorder %v2286_v55, 8.507059e+37 }
 0x14f   : > { %2743 = vst.msk [vmem:[%s4636_s7 + $0xe0] sm:$0xff] %vm2714_vm5, %v2710_v24  ;;  %v5029_v44 = vadd.f32 1.0, %v2988_v10  ;;  %2995 = vpow2.f32 %v2856_v12  ;;  %v2872_v1 = vmul.f32 -1.442695, %v5020_v16  ;;  %v2289_v39 = vor.u32 1.1754944e-38, %v2288_v4 }
 0x150   : > { %v2864_v7 = vmul.f32 -1.442695, %v5014_v45  ;;  %v2990_v15 = vpop.eup %2989  ;;  %v2281_v20 = vadd.f32 %v2984_v32, %v2280_v2  ;;  %v2406_v31 = vand.u32 2147483647, %v5017_v54  ;;  %v2408_v13 = vand.u32 2147483648, %v5017_v54 }
 0x151   : > { %v2992_v34 = vpop.eup %2991  ;;  %v5035_v47 = vadd.f32 1.0, %v2990_v15  ;;  %v2526_v63 = vand.u32 2147483647, %v5029_v44  ;;  %v2528_v22 = vand.u32 2147483648, %v5029_v44  ;;  %vm2402_vm6 = vweird.f32 %v5017_v54 }
 0x152   : > { %2997 = vpow2.f32 %v2864_v7  ;;  %v1927_v51 = vpop.f32.mrf.mxu0  ;;  %v2285_v17 = vsel %vm2284_vm1, %v2984_v32, %v2281_v20  ;;  %v5037_v60 = vadd.f32 1.0, %v2992_v34  ;;  %vm5048_vm8 = vcmp.eq.f32.partialorder %v2406_v31, 8.507059e+37 }
 0x153   : > { %2999 = vrcp.f32 %v5029_v44  ;;  %v2290_v37 = vsel %vm2287_vm3, %v2289_v39, %v2285_v17  ;;  %v2013_v19 = vmul.f32 %v4934_v6, %v1927_v51  ;;  %v2409_v50 = vor.u32 1.1754944e-38, %v2408_v13 }
 0x154   : > { %3001 = vpow2.f32 %v2872_v1  ;;  %v2994_v35 = vpop.eup %2993  ;;  %v2687_v48 = vmul.f32 %v2290_v37, %v4874_v52  ;;  %v2648_v52 = vand.u32 2147483648, %v5035_v47  ;;  %vm2522_vm15 = vweird.f32 %v5029_v44 }
 0x155   : > { %3003 = vrcp.f32 %v5035_v47  ;;  %v2996_v33 = vpop.eup %2995  ;;  %v2398_v9 = vmul.f32 %v2994_v35, %v5017_v54  ;;  %v2646_v28 = vand.u32 2147483647, %v5035_v47  ;;  %vm2403_vm14 = vweird.f32 %v2994_v35 }
 0x156   : > { %2720 = vst.msk [vmem:[%s4636_s7 + $0x28] sm:$0xff] %vm2714_vm5, %v2687_v48  ;;  %3005 = vrcp.f32 %v5037_v60  ;;  %v5056_v57 = vadd.f32 1.0, %v2996_v33  ;;  %vm5059_vm0 = vcmp.eq.f32.partialorder %v2526_v63, 8.507059e+37  ;;  %v2529_v0 = vor.u32 1.1754944e-38, %v2528_v22  ;;  %vm2404_vm10 = vmor %vm2402_vm6, %vm2403_vm14 }
 0x157   : > { %v2399_v25 = vsub.f32 1.0, %v2398_v9  ;;  %v5064_v36 = vadd.f32 %v4958_v18, %v2013_v19  ;;  %vm2642_vm2 = vweird.f32 %v5035_v47  ;;  %v2301_v23 = vand.u32 2147483647, %v5037_v60 }
 0x158   : > { %v2998_v14 = vpop.eup %2997  ;;  %v2303_v46 = vand.u32 2147483648, %v5037_v60  ;;  %3007 = vrcp.f32 %v5056_v57  ;;  %v2649_v3 = vor.u32 1.1754944e-38, %v2648_v52  ;;  %vm2297_vm4 = vweird.f32 %v5037_v60 }
 0x159   : > { %v3000_v61 = vpop.eup %2999  ;;  %v2400_v38 = vmul.f32 %v2994_v35, %v2399_v25  ;;  %v5071_v21 = vadd.f32 1.0, %v2998_v14  ;;  %vm5074_vm9 = vcmp.eq.f32.partialorder %v2646_v28, 8.507059e+37  ;;  %v2421_v53 = vand.u32 2147483647, %v5056_v57 }
 0x15a   : > { %v2518_v30 = vmul.f32 %v3000_v61, %v5029_v44  ;;  %v3002_v49 = vpop.eup %3001  ;;  %vm2523_vm7 = vweird.f32 %v3000_v61  ;;  %v2423_v24 = vand.u32 2147483648, %v5056_v57  ;;  %vm5087_vm11 = vcmp.eq.f32.partialorder %v2301_v23, 8.507059e+37 }
 0x15b   : > { %v3004_v40 = vpop.eup %3003  ;;  %v2401_v8 = vadd.f32 %v2994_v35, %v2400_v38  ;;  %v5078_v29 = vadd.f32 1.0, %v3002_v49  ;;  %3009 = vrcp.f32 %v5071_v21  ;;  %v2304_v7 = vor.u32 1.1754944e-38, %v2303_v46  ;;  %vm2524_vm1 = vmor %vm2522_vm15, %vm2523_vm7 }
 0x15c   : > { %v2519_v32 = vsub.f32 1.0, %v2518_v30  ;;  %v2638_v43 = vmul.f32 %v3004_v40, %v5035_v47  ;;  %v3006_v55 = vpop.eup %3005  ;;  %vm2643_vm12 = vweird.f32 %v3004_v40  ;;  %vm2417_vm13 = vweird.f32 %v5056_v57  ;;  %v1951_v30 = vpop.f32.mrf.mxu1 }
 0x15d   : > { %v2405_v11 = vsel %vm2404_vm10, %v2994_v35, %v2401_v8  ;;  %v2293_v4 = vmul.f32 %v3006_v55, %v5037_v60  ;;  %3011 = vrcp.f32 %v5078_v29  ;;  %vm5100_vm3 = vcmp.eq.f32.partialorder %v2421_v53, 8.507059e+37  ;;  %v1999_v38 = vpop.f32.mrf.mxu3 }
 0x15e   : > { %v2520_v56 = vmul.f32 %v3000_v61, %v2519_v32  ;;  %v2639_v10 = vsub.f32 1.0, %v2638_v43  ;;  %v2410_v54 = vsel %vm5048_vm8, %v2409_v50, %v2405_v11  ;;  %v3008_v1 = vpop.eup %3007  ;;  %v2424_v17 = vor.u32 1.1754944e-38, %v2423_v24  ;;  %vm2644_vm8 = vmor %vm2642_vm2, %vm2643_vm12 }
 0x15f   : > { %v2695_v15 = vmul.f32 %v2410_v54, %v4929_v27  ;;  %v2294_v51 = vsub.f32 1.0, %v2293_v4  ;;  %v2413_v39 = vmul.f32 %v3008_v1, %v5056_v57  ;;  %v2543_v13 = vand.u32 2147483648, %v5071_v21 }
 0x160   : > { %v2521_v2 = vadd.f32 %v3000_v61, %v2520_v56  ;;  %v2640_v20 = vmul.f32 %v3004_v40, %v2639_v10  ;;  %vm2298_vm6 = vweird.f32 %v3006_v55  ;;  %vm2537_vm15 = vweird.f32 %v5071_v21 }
 0x161   : > { %2728 = vst.msk [vmem:[%s4636_s7 + $0x68] sm:$0xff] %vm2714_vm5, %v2695_v15  ;;  %v2295_v37 = vmul.f32 %v3006_v55, %v2294_v51  ;;  %v3010_v19 = vpop.eup %3009  ;;  %v2414_v48 = vsub.f32 1.0, %v2413_v39  ;;  %v2541_v63 = vand.u32 2147483647, %v5071_v21  ;;  %vm2418_vm14 = vweird.f32 %v3008_v1 }
 0x162   : > { %v2525_v34 = vsel %vm2524_vm1, %v3000_v61, %v2521_v2  ;;  %v2641_v44 = vadd.f32 %v3004_v40, %v2640_v20  ;;  %v2533_v9 = vmul.f32 %v3010_v19, %v5071_v21  ;;  %v2544_v47 = vor.u32 1.1754944e-38, %v2543_v13  ;;  %v1975_v62 = vpop.f32.mrf.mxu2 }
 0x163   : > { %v2530_v27 = vsel %vm5059_vm0, %v2529_v0, %v2525_v34  ;;  %v2296_v33 = vadd.f32 %v3006_v55, %v2295_v37  ;;  %vm2299_vm0 = vmor %vm2297_vm4, %vm2298_vm6  ;;  %v2661_v58 = vand.u32 2147483647, %v5078_v29  ;;  %v3012_v50 = vpop.eup %3011  ;;  %v2849_v28 = vmul.f32 -1.442695, %v5064_v36 }
 0x164   : > { %v2703_v35 = vmul.f32 %v2530_v27, %v4961_v41  ;;  %v2645_v22 = vsel %vm2644_vm8, %v3004_v40, %v2641_v44  ;;  %v2415_v41 = vmul.f32 %v3008_v1, %v2414_v48  ;;  %v2534_v25 = vsub.f32 1.0, %v2533_v9  ;;  %vm2419_vm4 = vmor %vm2417_vm13, %vm2418_vm14 }
 0x165   : > { %v2650_v14 = vsel %vm5074_vm9, %v2649_v3, %v2645_v22  ;;  %v2300_v61 = vsel %vm2299_vm0, %v3006_v55, %v2296_v33  ;;  %vm2538_vm2 = vweird.f32 %v3010_v19  ;;  %v2653_v49 = vmul.f32 %v3012_v50, %v5078_v29 }
 0x166   : > { %2736 = vst.msk [vmem:[%s4636_s7 + $0xa8] sm:$0xff] %vm2714_vm5, %v2703_v35  ;;  %v2711_v52 = vmul.f32 %v2650_v14, %v4985_v59  ;;  %v2305_v0 = vsel %vm5087_vm11, %v2304_v7, %v2300_v61  ;;  %v2416_v60 = vadd.f32 %v3008_v1, %v2415_v41  ;;  %v2535_v59 = vmul.f32 %v3010_v19, %v2534_v25  ;;  %vm2539_vm9 = vmor %vm2537_vm15, %vm2538_vm2 }
 0x167   : > { %v2688_v23 = vmul.f32 %v2305_v0, %v4988_v5  ;;  %v2663_v46 = vand.u32 2147483648, %v5078_v29  ;;  %3013 = vpow2.f32 %v2849_v28  ;;  %v2654_v32 = vsub.f32 1.0, %v2653_v49 }
 0x168   : > { %2744 = vst.msk [vmem:[%s4636_s7 + $0xe8] sm:$0xff] %vm2714_vm5, %v2711_v52  ;;  %v2420_v40 = vsel %vm2419_vm4, %v3008_v1, %v2416_v60  ;;  %v2021_v3 = vmul.f32 %v4934_v6, %v1951_v30  ;;  %v2029_v8 = vmul.f32 %v4934_v6, %v1975_v62  ;;  %v2536_v43 = vadd.f32 %v3010_v19, %v2535_v59 }
 0x169   : > { %2721 = vst.msk [vmem:[%s4636_s7 + $0x30] sm:$0xff] %vm2714_vm5, %v2688_v23  ;;  %v2425_v5 = vsel %vm5100_vm3, %v2424_v17, %v2420_v40  ;;  %vm2658_vm7 = vweird.f32 %v3012_v50  ;;  %v2037_v57 = vmul.f32 %v4934_v6, %v1999_v38  ;;  %v2655_v55 = vmul.f32 %v3012_v50, %v2654_v32 }
 0x16a   : > { %v2696_v42 = vmul.f32 %v2425_v5, %v5011_v26  ;;  %v5147_v56 = vadd.f32 %v4958_v18, %v2021_v3  ;;  %v5150_v53 = vadd.f32 %v4958_v18, %v2029_v8  ;;  %v2540_v24 = vsel %vm2539_vm9, %v3010_v19, %v2536_v43 }
 0x16b   : > { %vm2542_vm10 = vcmp.eq.f32.partialorder %v2541_v63, 8.507059e+37  ;;  %vm2657_vm11 = vweird.f32 %v5078_v29  ;;  %v5154_v6 = vadd.f32 %v4958_v18, %v2037_v57  ;;  %v2656_v21 = vadd.f32 %v3012_v50, %v2655_v55 }
 0x16c   : > { %2729 = vst.msk [vmem:[%s4636_s7 + $0x70] sm:$0xff] %vm2714_vm5, %v2696_v42  ;;  %v2545_v26 = vsel %vm2542_vm10, %v2544_v47, %v2540_v24  ;;  %v2857_v11 = vmul.f32 -1.442695, %v5147_v56  ;;  %v2865_v10 = vmul.f32 -1.442695, %v5150_v53  ;;  %vm2659_vm12 = vmor %vm2657_vm11, %vm2658_vm7  ;;  %v2664_v7 = vor.u32 1.1754944e-38, %v2663_v46 }
 0x16d   : > { %v3014_v4 = vpop.eup %3013  ;;  %v2704_v12 = vmul.f32 %v2545_v26, %v5014_v45  ;;  %v2873_v29 = vmul.f32 -1.442695, %v5154_v6  ;;  %v2660_v54 = vsel %vm2659_vm12, %v3012_v50, %v2656_v21  ;;  %vm2662_vm13 = vcmp.eq.f32.partialorder %v2661_v58, 8.507059e+37 }
 0x16e   : > { %v2177_v18 = vadd.f32 1.0, %v3014_v4  ;;  %3015 = vpow2.f32 %v2857_v11  ;;  %v2665_v2 = vsel %vm2662_vm13, %v2664_v7, %v2660_v54 }
 0x16f   : > { %2737 = vst.msk [vmem:[%s4636_s7 + $0xb0] sm:$0xff] %vm2714_vm5, %v2704_v12  ;;  %3017 = vpow2.f32 %v2865_v10  ;;  %v2712_v1 = vmul.f32 %v2665_v2, %v5020_v16 }
 0x170   : > { %3019 = vrcp.f32 %v2177_v18  ;;  %vm2312_vm1 = vweird.f32 %v2177_v18  ;;  %v2318_v27 = vand.u32 2147483648, %v2177_v18  ;;  %v2316_v16 = vand.u32 2147483647, %v2177_v18 }
 0x171   : > { %3021 = vpow2.f32 %v2873_v29  ;;  %2745 = vst.msk [vmem:[%s4636_s7 + $0xf0] sm:$0xff] %vm2714_vm5, %v2712_v1 }
 0x172   : > { %v2319_v48 = vor.u32 1.1754944e-38, %v2318_v27  ;;  %vm2317_vm8 = vcmp.eq.f32.partialorder %v2316_v16, 8.507059e+37 }
 0x174   : > { %v3016_v45 = vpop.eup %3015 }
 0x175   : > { %v3018_v15 = vpop.eup %3017  ;;  %v2185_v20 = vadd.f32 1.0, %v3016_v45 }
 0x176   : > { %v3020_v51 = vpop.eup %3019  ;;  %v2193_v34 = vadd.f32 1.0, %v3018_v15 }
 0x177   : > { %v3022_v39 = vpop.eup %3021  ;;  %v2308_v31 = vmul.f32 %v3020_v51, %v2177_v18  ;;  %3023 = vrcp.f32 %v2185_v20  ;;  %vm2313_vm3 = vweird.f32 %v3020_v51  ;;  %v2436_v41 = vand.u32 2147483647, %v2185_v20 }
 0x178   : > { %3025 = vrcp.f32 %v2193_v34  ;;  %v2201_v13 = vadd.f32 1.0, %v3022_v39  ;;  %vm2314_vm6 = vmor %vm2312_vm1, %vm2313_vm3  ;;  %v2438_v50 = vand.u32 2147483648, %v2185_v20  ;;  %v2558_v61 = vand.u32 2147483648, %v2193_v34 }
 0x179   : > { %v2309_v17 = vsub.f32 1.0, %v2308_v31  ;;  %vm2432_vm15 = vweird.f32 %v2185_v20  ;;  %v2556_v62 = vand.u32 2147483647, %v2193_v34  ;;  %vm2437_vm2 = vcmp.eq.f32.partialorder %v2436_v41, 8.507059e+37 }
 0x17a   : > { %3027 = vrcp.f32 %v2201_v13  ;;  %vm2552_vm4 = vweird.f32 %v2193_v34  ;;  %v2439_v49 = vor.u32 1.1754944e-38, %v2438_v50  ;;  %v2678_v23 = vand.u32 2147483648, %v2201_v13 }
 0x17b   : > { %v2310_v44 = vmul.f32 %v3020_v51, %v2309_v17  ;;  %v2676_v40 = vand.u32 2147483647, %v2201_v13  ;;  %vm2557_vm11 = vcmp.eq.f32.partialorder %v2556_v62, 8.507059e+37  ;;  %vm2672_vm12 = vweird.f32 %v2201_v13 }
 0x17c   : > { %v2679_v42 = vor.u32 1.1754944e-38, %v2678_v23 }
 0x17d   : > { %v3024_v37 = vpop.eup %3023  ;;  %v2311_v19 = vadd.f32 %v3020_v51, %v2310_v44  ;;  %vm2677_vm1 = vcmp.eq.f32.partialorder %v2676_v40, 8.507059e+37 }
 0x17e   : > { %v3026_v35 = vpop.eup %3025  ;;  %v2428_v63 = vmul.f32 %v3024_v37, %v2185_v20  ;;  %vm2433_vm14 = vweird.f32 %v3024_v37 }
 0x17f   : > { %v2315_v22 = vsel %vm2314_vm6, %v3020_v51, %v2311_v19  ;;  %v2548_v33 = vmul.f32 %v3026_v35, %v2193_v34  ;;  %vm2553_vm0 = vweird.f32 %v3026_v35  ;;  %vm2434_vm7 = vmor %vm2432_vm15, %vm2433_vm14 }
 0x180   : > { %v2320_v9 = vsel %vm2317_vm8, %v2319_v48, %v2315_v22  ;;  %v2429_v14 = vsub.f32 1.0, %v2428_v63  ;;  %v3028_v47 = vpop.eup %3027  ;;  %vm2554_vm9 = vmor %vm2552_vm4, %vm2553_vm0 }
 0x181   : > { %v2689_v58 = vmul.f32 %v2320_v9, %v5064_v36  ;;  %v2549_v52 = vsub.f32 1.0, %v2548_v33  ;;  %v2668_v28 = vmul.f32 %v3028_v47, %v2201_v13  ;;  %v2559_v36 = vor.u32 1.1754944e-38, %v2558_v61 }
 0x182   : > { %v2430_v25 = vmul.f32 %v3024_v37, %v2429_v14  ;;  %vm2673_vm10 = vweird.f32 %v3028_v47 }
 0x183   : > { %2722 = vst.msk [vmem:[%s4636_s7 + $0x38] sm:$0xff] %vm2714_vm5, %v2689_v58  ;;  %v2550_v30 = vmul.f32 %v3026_v35, %v2549_v52  ;;  %v2669_v60 = vsub.f32 1.0, %v2668_v28  ;;  %vm2674_vm13 = vmor %vm2672_vm12, %vm2673_vm10 }
 0x184   : > { %v2431_v0 = vadd.f32 %v3024_v37, %v2430_v25 }
 0x185   : > { %v2551_v38 = vadd.f32 %v3026_v35, %v2550_v30  ;;  %v2670_v46 = vmul.f32 %v3028_v47, %v2669_v60 }
 0x186   : > { %v2435_v59 = vsel %vm2434_vm7, %v3024_v37, %v2431_v0 }
 0x187   : > { %v2440_v32 = vsel %vm2437_vm2, %v2439_v49, %v2435_v59  ;;  %v2555_v3 = vsel %vm2554_vm9, %v3026_v35, %v2551_v38  ;;  %v2671_v43 = vadd.f32 %v3028_v47, %v2670_v46 }
 0x188   : > { %v2697_v8 = vmul.f32 %v2440_v32, %v5147_v56  ;;  %v2560_v5 = vsel %vm2557_vm11, %v2559_v36, %v2555_v3 }
 0x189   : > { %v2705_v57 = vmul.f32 %v2560_v5, %v5150_v53  ;;  %v2675_v55 = vsel %vm2674_vm13, %v3028_v47, %v2671_v43 }
 0x18a   : > { %2730 = vst.msk [vmem:[%s4636_s7 + $0x78] sm:$0xff] %vm2714_vm5, %v2697_v8  ;;  %v2680_v24 = vsel %vm2677_vm1, %v2679_v42, %v2675_v55 }
 0x18b   : > { %2738 = vst.msk [vmem:[%s4636_s7 + $0xb8] sm:$0xff] %vm2714_vm5, %v2705_v57  ;;  %v2713_v26 = vmul.f32 %v2680_v24, %v5154_v6 }
 0x18d   : > { %2746 = vst.msk [vmem:[%s4636_s7 + $0xf8] sm:$0xff] %vm2714_vm5, %v2713_v26 }
 0x18e PF: > { %s16_s21 = sadd.s32 1, %s3083_s21  }
 0x18f   : > { %p13_p4 = scmp.ge.s32.totalorder %s16_s21, 4  }
 0x191   :  { %15 = sbr.rel (!%p13_p4) target bundleno = 1 (0x1), region = 74 }

</bundles_post_ra>
